<compile_context>
chip_gen: v7x
topology: tpu7x:2x2x1
jax: 0.10.0
libtpu: 0.0.40
codegen_flags: <defaults>
</compile_context>

<pallas_src>
import functools
import math

import jax
import jax.numpy as jnp
from jax import lax
from jax.experimental import pallas as pl
from jax.experimental.pallas import tpu as pltpu


def _round_up(n, m):
    return ((n + m - 1) // m) * m


# ------------------------------ fused kernel --------------------------------

def _fused_gru_fc_kernel(x_ref, *args, num_layers, T, Bpad, H):
    """Fused multi-layer GRU + Linear.

    args = [w_ih_t, w_hh_t, b_ih, b_hh] * num_layers + [fc_w_t, fc_b]
           + [out_ref] + [gi_scr, seq_scr]

    x_ref   : (T*Bpad, D)   time-major, batch padded to Bpad rows per step
    gi_scr  : (T*Bpad, 3H)  hoisted input projections for the current layer
    seq_scr : (T*Bpad, H)   current layer's output sequence (VMEM resident)
    out_ref : (T*Bpad, O)
    """
    w_refs = args[: 4 * num_layers]
    fcw_ref, fcb_ref, out_ref, gi_scr, seq_scr = args[4 * num_layers:]
    H3 = 3 * H

    for l in range(num_layers):
        wih_ref, whh_ref, bih_ref, bhh_ref = w_refs[4 * l: 4 * l + 4]

        # --- Hoisted, time-independent input projection: one MXU matmul over
        #     all T*Bpad rows (b_ih folded in here, outside the recurrence). ---
        inp = x_ref[...] if l == 0 else seq_scr[...]
        gi_scr[...] = (
            jnp.dot(inp, wih_ref[...], preferred_element_type=jnp.float32)
            + bih_ref[...]
        )

        # Hoist recurrent weights + b_hh broadcast out of the time loop.
        whh = whh_ref[...]                                   # (H, 3H)
        bhh = jnp.broadcast_to(bhh_ref[...], (Bpad, H3))     # (Bpad, 3H)

        h = jnp.zeros((Bpad, H), jnp.float32)                # h0 = 0
        for t in range(T):  # T static & small -> fully unrolled, aligned static slices
            gi = gi_scr[pl.ds(t * Bpad, Bpad), :]            # (Bpad, 3H)
            gh = jnp.dot(h, whh, preferred_element_type=jnp.float32) + bhh
            # sigmoid(x) = 0.5 * (tanh(0.5 x) + 1): one EUP op per gate.
            r = 0.5 * (jnp.tanh(0.5 * (gi[:, 0:H] + gh[:, 0:H])) + 1.0)
            z = 0.5 * (jnp.tanh(0.5 * (gi[:, H:2 * H] + gh[:, H:2 * H])) + 1.0)
            n = jnp.tanh(gi[:, 2 * H:H3] + r * gh[:, 2 * H:H3])
            h = (1.0 - z) * n + z * h
            seq_scr[pl.ds(t * Bpad, Bpad), :] = h

    # --- Fused final Linear over the whole sequence: one matmul, one store. ---
    out_ref[...] = (
        jnp.dot(seq_scr[...], fcw_ref[...], preferred_element_type=jnp.float32)
        + fcb_ref[...]
    )


# ------------------------------ wrappers ------------------------------------

def _fused_forward_2d(x2d, params, *, T, Bpad):
    """x2d: (T*Bpad, D) -> (T*Bpad, O) via one fused pallas_call."""
    layers = params["gru_layers"]
    num_layers = len(layers)
    H = layers[0]["w_hh_t"].shape[0]
    O = params["fc_w_t"].shape[1]
    TB = x2d.shape[0]

    operands = [x2d]
    in_specs = [pl.BlockSpec(x2d.shape, lambda: (0, 0))]
    for lyr in layers:
        for name in ("w_ih_t", "w_hh_t", "b_ih", "b_hh"):
            a = lyr[name]
            operands.append(a)
            in_specs.append(pl.BlockSpec(a.shape, lambda: (0, 0)))
    operands += [params["fc_w_t"], params["fc_b"]]
    in_specs += [pl.BlockSpec(params["fc_w_t"].shape, lambda: (0, 0)),
                 pl.BlockSpec(params["fc_b"].shape, lambda: (0, 0))]

    kernel = functools.partial(
        _fused_gru_fc_kernel, num_layers=num_layers, T=T, Bpad=Bpad, H=H)

    return pl.pallas_call(
        kernel,
        out_shape=jax.ShapeDtypeStruct((TB, O), jnp.float32),
        in_specs=in_specs,
        out_specs=pl.BlockSpec((TB, O), lambda: (0, 0)),
        scratch_shapes=[
            pltpu.VMEM((TB, 3 * H), jnp.float32),   # hoisted input projections
            pltpu.VMEM((TB, H), jnp.float32),       # layer output sequence
        ],
    )(*operands)


def _gru_stack_and_fc(x_btd, params):
    """(B, T, D) -> (B, T, O): multi-layer GRU (h0 = 0) then Linear on all steps."""
    B, T, _ = x_btd.shape
    Bpad = _round_up(B, 8)
    # Time-major, batch padded to a full sublane tile, flattened to 2-D rows
    # (row index = t*Bpad + b).  These are tiny XLA ops; all heavy work and all
    # inter-layer traffic happens inside the single fused kernel.
    x_tbd = jnp.transpose(x_btd, (1, 0, 2))
    x_pad = jnp.pad(x_tbd, ((0, 0), (0, Bpad - B), (0, 0)))
    x2d = x_pad.reshape(T * Bpad, x_pad.shape[-1])
    y2d = _fused_forward_2d(x2d, params, T=T, Bpad=Bpad)
    O = y2d.shape[-1]
    y = y2d.reshape(T, Bpad, O)[:, :B, :]
    return jnp.transpose(y, (1, 0, 2))


def gru_model_2_forward(x, params, future=0):
    """Mirrors GRUModel_2.forward(x, future)."""
    out = _gru_stack_and_fc(x, params)
    for _ in range(future):
        # Only valid when output_dim == input_dim (same implicit requirement as
        # the original PyTorch code).
        last_output = lax.stop_gradient(out[:, -5:, :])
        out_pred = _gru_stack_and_fc(last_output, params)[:, -5:, :]
        out = jnp.concatenate([out, out_pred], axis=1)
    return out


# ------------------------- deterministic param init -------------------------

def init_params(key, input_dim, hidden_dim, output_dim, num_layers):
    k_gru = 1.0 / math.sqrt(hidden_dim)
    layers = []
    for l in range(num_layers):
        in_dim = input_dim if l == 0 else hidden_dim
        key, k1, k2, k3, k4 = jax.random.split(key, 5)
        w_ih = jax.random.uniform(k1, (3 * hidden_dim, in_dim), jnp.float32, -k_gru, k_gru)
        w_hh = jax.random.uniform(k2, (3 * hidden_dim, hidden_dim), jnp.float32, -k_gru, k_gru)
        b_ih = jax.random.uniform(k3, (3 * hidden_dim,), jnp.float32, -k_gru, k_gru)
        b_hh = jax.random.uniform(k4, (3 * hidden_dim,), jnp.float32, -k_gru, k_gru)
        layers.append(dict(
            w_ih_t=w_ih.T,                        # (in, 3H), gate order [r, z, n]
            w_hh_t=w_hh.T,                        # (H, 3H)
            b_ih=b_ih.reshape(1, 3 * hidden_dim),
            b_hh=b_hh.reshape(1, 3 * hidden_dim),
        ))
    k_fc = 1.0 / math.sqrt(hidden_dim)
    key, k5, k6 = jax.random.split(key, 3)
    fc_w = jax.random.uniform(k5, (output_dim, hidden_dim), jnp.float32, -k_fc, k_fc)
    fc_b = jax.random.uniform(k6, (output_dim,), jnp.float32, -k_fc, k_fc)
    return dict(gru_layers=layers, fc_w_t=fc_w.T, fc_b=fc_b.reshape(1, output_dim))


# ----------------------------- pure-JAX reference ----------------------------

def _reference_forward(x, params):
    def one_layer(x_tbd, layer):
        H = layer["w_hh_t"].shape[0]

        def step(h, x_t):
            gi = x_t @ layer["w_ih_t"] + layer["b_ih"]
            gh = h @ layer["w_hh_t"] + layer["b_hh"]
            r = jax.nn.sigmoid(gi[:, :H] + gh[:, :H])
            z = jax.nn.sigmoid(gi[:, H:2 * H] + gh[:, H:2 * H])
            n = jnp.tanh(gi[:, 2 * H:] + r * gh[:, 2 * H:])
            h_new = (1.0 - z) * n + z * h
            return h_new, h_new

        h0 = jnp.zeros((x_tbd.shape[1], H), jnp.float32)
        _, ys = lax.scan(step, h0, x_tbd)
        return ys

    h = jnp.transpose(x, (1, 0, 2))
    for layer in params["gru_layers"]:
        h = one_layer(h, layer)
    y = h @ params["fc_w_t"] + params["fc_b"]
    return jnp.transpose(y, (1, 0, 2))


# ----------------------------------- main ------------------------------------

if __name__ == "__main__":
    B, T = 2, 8
    input_dim, hidden_dim, output_dim, num_layers = 16, 32, 16, 2

    key = jax.random.PRNGKey(0)
    key, kx = jax.random.split(key)
    x = jax.random.normal(kx, (B, T, input_dim), jnp.float32)

    params = init_params(key, input_dim, hidden_dim, output_dim, num_layers)

    fwd = jax.jit(functools.partial(gru_model_2_forward, future=0))
    out = fwd(x, params)
    out = jax.block_until_ready(out)

    ref = jax.block_until_ready(_reference_forward(x, params))
    assert out.shape == (B, T, output_dim)
    assert jnp.allclose(out, ref, atol=1e-4, rtol=1e-4)

    print("KERNEL_OK")
</pallas_src>

<mosaic_0001>
module attributes {stable_mosaic.version = 11 : i64} {
  func.func @_fused_gru_fc_kernel(%arg0: memref<64x16xf32, #tpu.memory_space<vmem>>, %arg1: memref<16x96xf32, #tpu.memory_space<vmem>>, %arg2: memref<32x96xf32, #tpu.memory_space<vmem>>, %arg3: memref<1x96xf32, #tpu.memory_space<vmem>>, %arg4: memref<1x96xf32, #tpu.memory_space<vmem>>, %arg5: memref<32x96xf32, #tpu.memory_space<vmem>>, %arg6: memref<32x96xf32, #tpu.memory_space<vmem>>, %arg7: memref<1x96xf32, #tpu.memory_space<vmem>>, %arg8: memref<1x96xf32, #tpu.memory_space<vmem>>, %arg9: memref<32x16xf32, #tpu.memory_space<vmem>>, %arg10: memref<1x16xf32, #tpu.memory_space<vmem>>, %arg11: memref<64x16xf32, #tpu.memory_space<vmem>>, %arg12: memref<64x96xf32, #tpu.memory_space<vmem>>, %arg13: memref<64x32xf32, #tpu.memory_space<vmem>>) attributes {dimension_semantics = [], scalar_prefetch = 0 : i64, scratch_operands = 2 : i64, tpu.core_type = #tpu.core_type<tc>} {
    %c0 = arith.constant 0 : index
    %c0_0 = arith.constant 0 : index
    %0 = vector.load %arg0[%c0, %c0_0] : memref<64x16xf32, #tpu.memory_space<vmem>>, vector<64x16xf32>
    %c0_1 = arith.constant 0 : index
    %c0_2 = arith.constant 0 : index
    %1 = vector.load %arg1[%c0_1, %c0_2] : memref<16x96xf32, #tpu.memory_space<vmem>>, vector<16x96xf32>
    %cst = arith.constant dense<0.000000e+00> : vector<64x96xf32>
    %2 = tpu.matmul %0, %1, %cst {dimension_numbers = #tpu.dot_dimension_numbers<[1], [0], [0], [1], [0, 0, 1, 1], [], []>} : vector<64x16xf32>, vector<16x96xf32>, vector<64x96xf32> -> vector<64x96xf32>
    %c0_3 = arith.constant 0 : index
    %c0_4 = arith.constant 0 : index
    %3 = vector.load %arg3[%c0_3, %c0_4] : memref<1x96xf32, #tpu.memory_space<vmem>>, vector<1x96xf32>
    %4 = vector.broadcast %3 : vector<1x96xf32> to vector<64x96xf32>
    %5 = arith.addf %2, %4 : vector<64x96xf32>
    %c0_5 = arith.constant 0 : index
    %c0_6 = arith.constant 0 : index
    %6 = vector.load %arg12[%c0_5, %c0_6] : memref<64x96xf32, #tpu.memory_space<vmem>>, vector<64x96xf32>
    tpu.vector_store %arg12[%c0_5, %c0_6], %5 {strides = array<i32>} : memref<64x96xf32, #tpu.memory_space<vmem>>, vector<64x96xf32>,
    %c0_7 = arith.constant 0 : index
    %c0_8 = arith.constant 0 : index
    %7 = vector.load %arg2[%c0_7, %c0_8] : memref<32x96xf32, #tpu.memory_space<vmem>>, vector<32x96xf32>
    %c0_9 = arith.constant 0 : index
    %c0_10 = arith.constant 0 : index
    %8 = vector.load %arg4[%c0_9, %c0_10] : memref<1x96xf32, #tpu.memory_space<vmem>>, vector<1x96xf32>
    %9 = vector.shape_cast %8 : vector<1x96xf32> to vector<1x96xf32>
    %10 = vector.broadcast %9 : vector<1x96xf32> to vector<8x96xf32>
    %cst_11 = arith.constant 0.000000e+00 : f32
    %11 = vector.broadcast %cst_11 : f32 to vector<8x32xf32>
    %c0_12 = arith.constant 0 : index
    %c0_13 = arith.constant 0 : index
    %12 = vector.load %arg12[%c0_12, %c0_13] : memref<64x96xf32, #tpu.memory_space<vmem>>, vector<8x96xf32>
    %cst_14 = arith.constant dense<0.000000e+00> : vector<8x96xf32>
    %13 = tpu.matmul %11, %7, %cst_14 {dimension_numbers = #tpu.dot_dimension_numbers<[1], [0], [0], [1], [0, 0, 1, 1], [], []>} : vector<8x32xf32>, vector<32x96xf32>, vector<8x96xf32> -> vector<8x96xf32>
    %14 = arith.addf %13, %10 : vector<8x96xf32>
    %15 = vector.extract_strided_slice %12 {offsets = [0, 0], sizes = [8, 32], strides = [1, 1]} : vector<8x96xf32> to vector<8x32xf32>
    %16 = vector.extract_strided_slice %14 {offsets = [0, 0], sizes = [8, 32], strides = [1, 1]} : vector<8x96xf32> to vector<8x32xf32>
    %17 = arith.addf %15, %16 : vector<8x32xf32>
    %cst_15 = arith.constant 5.000000e-01 : f32
    %18 = vector.broadcast %cst_15 : f32 to vector<8x32xf32>
    %19 = arith.mulf %18, %17 : vector<8x32xf32>
    %20 = math.tanh %19 : vector<8x32xf32>
    %cst_16 = arith.constant 1.000000e+00 : f32
    %21 = vector.broadcast %cst_16 : f32 to vector<8x32xf32>
    %22 = arith.addf %20, %21 : vector<8x32xf32>
    %cst_17 = arith.constant 5.000000e-01 : f32
    %23 = vector.broadcast %cst_17 : f32 to vector<8x32xf32>
    %24 = arith.mulf %23, %22 : vector<8x32xf32>
    %25 = vector.extract_strided_slice %12 {offsets = [0, 32], sizes = [8, 32], strides = [1, 1]} : vector<8x96xf32> to vector<8x32xf32>
    %26 = vector.extract_strided_slice %14 {offsets = [0, 32], sizes = [8, 32], strides = [1, 1]} : vector<8x96xf32> to vector<8x32xf32>
    %27 = arith.addf %25, %26 : vector<8x32xf32>
    %cst_18 = arith.constant 5.000000e-01 : f32
    %28 = vector.broadcast %cst_18 : f32 to vector<8x32xf32>
    %29 = arith.mulf %28, %27 : vector<8x32xf32>
    %30 = math.tanh %29 : vector<8x32xf32>
    %cst_19 = arith.constant 1.000000e+00 : f32
    %31 = vector.broadcast %cst_19 : f32 to vector<8x32xf32>
    %32 = arith.addf %30, %31 : vector<8x32xf32>
    %cst_20 = arith.constant 5.000000e-01 : f32
    %33 = vector.broadcast %cst_20 : f32 to vector<8x32xf32>
    %34 = arith.mulf %33, %32 : vector<8x32xf32>
    %35 = vector.extract_strided_slice %12 {offsets = [0, 64], sizes = [8, 32], strides = [1, 1]} : vector<8x96xf32> to vector<8x32xf32>
    %36 = vector.extract_strided_slice %14 {offsets = [0, 64], sizes = [8, 32], strides = [1, 1]} : vector<8x96xf32> to vector<8x32xf32>
    %37 = arith.mulf %24, %36 : vector<8x32xf32>
    %38 = arith.addf %35, %37 : vector<8x32xf32>
    %39 = math.tanh %38 : vector<8x32xf32>
    %cst_21 = arith.constant 1.000000e+00 : f32
    %40 = vector.broadcast %cst_21 : f32 to vector<8x32xf32>
    %41 = arith.subf %40, %34 : vector<8x32xf32>
    %42 = arith.mulf %41, %39 : vector<8x32xf32>
    %43 = arith.mulf %34, %11 : vector<8x32xf32>
    %44 = arith.addf %42, %43 : vector<8x32xf32>
    %c0_22 = arith.constant 0 : index
    %c0_23 = arith.constant 0 : index
    %45 = vector.load %arg13[%c0_22, %c0_23] : memref<64x32xf32, #tpu.memory_space<vmem>>, vector<8x32xf32>
    tpu.vector_store %arg13[%c0_22, %c0_23], %44 {strides = array<i32>} : memref<64x32xf32, #tpu.memory_space<vmem>>, vector<8x32xf32>,
    %c8 = arith.constant 8 : index
    %c0_24 = arith.constant 0 : index
    %46 = vector.load %arg12[%c8, %c0_24] : memref<64x96xf32, #tpu.memory_space<vmem>>, vector<8x96xf32>
    %cst_25 = arith.constant dense<0.000000e+00> : vector<8x96xf32>
    %47 = tpu.matmul %44, %7, %cst_25 {dimension_numbers = #tpu.dot_dimension_numbers<[1], [0], [0], [1], [0, 0, 1, 1], [], []>} : vector<8x32xf32>, vector<32x96xf32>, vector<8x96xf32> -> vector<8x96xf32>
    %48 = arith.addf %47, %10 : vector<8x96xf32>
    %49 = vector.extract_strided_slice %46 {offsets = [0, 0], sizes = [8, 32], strides = [1, 1]} : vector<8x96xf32> to vector<8x32xf32>
    %50 = vector.extract_strided_slice %48 {offsets = [0, 0], sizes = [8, 32], strides = [1, 1]} : vector<8x96xf32> to vector<8x32xf32>
    %51 = arith.addf %49, %50 : vector<8x32xf32>
    %cst_26 = arith.constant 5.000000e-01 : f32
    %52 = vector.broadcast %cst_26 : f32 to vector<8x32xf32>
    %53 = arith.mulf %52, %51 : vector<8x32xf32>
    %54 = math.tanh %53 : vector<8x32xf32>
    %cst_27 = arith.constant 1.000000e+00 : f32
    %55 = vector.broadcast %cst_27 : f32 to vector<8x32xf32>
    %56 = arith.addf %54, %55 : vector<8x32xf32>
    %cst_28 = arith.constant 5.000000e-01 : f32
    %57 = vector.broadcast %cst_28 : f32 to vector<8x32xf32>
    %58 = arith.mulf %57, %56 : vector<8x32xf32>
    %59 = vector.extract_strided_slice %46 {offsets = [0, 32], sizes = [8, 32], strides = [1, 1]} : vector<8x96xf32> to vector<8x32xf32>
    %60 = vector.extract_strided_slice %48 {offsets = [0, 32], sizes = [8, 32], strides = [1, 1]} : vector<8x96xf32> to vector<8x32xf32>
    %61 = arith.addf %59, %60 : vector<8x32xf32>
    %cst_29 = arith.constant 5.000000e-01 : f32
    %62 = vector.broadcast %cst_29 : f32 to vector<8x32xf32>
    %63 = arith.mulf %62, %61 : vector<8x32xf32>
    %64 = math.tanh %63 : vector<8x32xf32>
    %cst_30 = arith.constant 1.000000e+00 : f32
    %65 = vector.broadcast %cst_30 : f32 to vector<8x32xf32>
    %66 = arith.addf %64, %65 : vector<8x32xf32>
    %cst_31 = arith.constant 5.000000e-01 : f32
    %67 = vector.broadcast %cst_31 : f32 to vector<8x32xf32>
    %68 = arith.mulf %67, %66 : vector<8x32xf32>
    %69 = vector.extract_strided_slice %46 {offsets = [0, 64], sizes = [8, 32], strides = [1, 1]} : vector<8x96xf32> to vector<8x32xf32>
    %70 = vector.extract_strided_slice %48 {offsets = [0, 64], sizes = [8, 32], strides = [1, 1]} : vector<8x96xf32> to vector<8x32xf32>
    %71 = arith.mulf %58, %70 : vector<8x32xf32>
    %72 = arith.addf %69, %71 : vector<8x32xf32>
    %73 = math.tanh %72 : vector<8x32xf32>
    %cst_32 = arith.constant 1.000000e+00 : f32
    %74 = vector.broadcast %cst_32 : f32 to vector<8x32xf32>
    %75 = arith.subf %74, %68 : vector<8x32xf32>
    %76 = arith.mulf %75, %73 : vector<8x32xf32>
    %77 = arith.mulf %68, %44 : vector<8x32xf32>
    %78 = arith.addf %76, %77 : vector<8x32xf32>
    %c8_33 = arith.constant 8 : index
    %c0_34 = arith.constant 0 : index
    %79 = vector.load %arg13[%c8_33, %c0_34] : memref<64x32xf32, #tpu.memory_space<vmem>>, vector<8x32xf32>
    tpu.vector_store %arg13[%c8_33, %c0_34], %78 {strides = array<i32>} : memref<64x32xf32, #tpu.memory_space<vmem>>, vector<8x32xf32>,
    %c16 = arith.constant 16 : index
    %c0_35 = arith.constant 0 : index
    %80 = vector.load %arg12[%c16, %c0_35] : memref<64x96xf32, #tpu.memory_space<vmem>>, vector<8x96xf32>
    %cst_36 = arith.constant dense<0.000000e+00> : vector<8x96xf32>
    %81 = tpu.matmul %78, %7, %cst_36 {dimension_numbers = #tpu.dot_dimension_numbers<[1], [0], [0], [1], [0, 0, 1, 1], [], []>} : vector<8x32xf32>, vector<32x96xf32>, vector<8x96xf32> -> vector<8x96xf32>
    %82 = arith.addf %81, %10 : vector<8x96xf32>
    %83 = vector.extract_strided_slice %80 {offsets = [0, 0], sizes = [8, 32], strides = [1, 1]} : vector<8x96xf32> to vector<8x32xf32>
    %84 = vector.extract_strided_slice %82 {offsets = [0, 0], sizes = [8, 32], strides = [1, 1]} : vector<8x96xf32> to vector<8x32xf32>
    %85 = arith.addf %83, %84 : vector<8x32xf32>
    %cst_37 = arith.constant 5.000000e-01 : f32
    %86 = vector.broadcast %cst_37 : f32 to vector<8x32xf32>
    %87 = arith.mulf %86, %85 : vector<8x32xf32>
    %88 = math.tanh %87 : vector<8x32xf32>
    %cst_38 = arith.constant 1.000000e+00 : f32
    %89 = vector.broadcast %cst_38 : f32 to vector<8x32xf32>
    %90 = arith.addf %88, %89 : vector<8x32xf32>
    %cst_39 = arith.constant 5.000000e-01 : f32
    %91 = vector.broadcast %cst_39 : f32 to vector<8x32xf32>
    %92 = arith.mulf %91, %90 : vector<8x32xf32>
    %93 = vector.extract_strided_slice %80 {offsets = [0, 32], sizes = [8, 32], strides = [1, 1]} : vector<8x96xf32> to vector<8x32xf32>
    %94 = vector.extract_strided_slice %82 {offsets = [0, 32], sizes = [8, 32], strides = [1, 1]} : vector<8x96xf32> to vector<8x32xf32>
    %95 = arith.addf %93, %94 : vector<8x32xf32>
    %cst_40 = arith.constant 5.000000e-01 : f32
    %96 = vector.broadcast %cst_40 : f32 to vector<8x32xf32>
    %97 = arith.mulf %96, %95 : vector<8x32xf32>
    %98 = math.tanh %97 : vector<8x32xf32>
    %cst_41 = arith.constant 1.000000e+00 : f32
    %99 = vector.broadcast %cst_41 : f32 to vector<8x32xf32>
    %100 = arith.addf %98, %99 : vector<8x32xf32>
    %cst_42 = arith.constant 5.000000e-01 : f32
    %101 = vector.broadcast %cst_42 : f32 to vector<8x32xf32>
    %102 = arith.mulf %101, %100 : vector<8x32xf32>
    %103 = vector.extract_strided_slice %80 {offsets = [0, 64], sizes = [8, 32], strides = [1, 1]} : vector<8x96xf32> to vector<8x32xf32>
    %104 = vector.extract_strided_slice %82 {offsets = [0, 64], sizes = [8, 32], strides = [1, 1]} : vector<8x96xf32> to vector<8x32xf32>
    %105 = arith.mulf %92, %104 : vector<8x32xf32>
    %106 = arith.addf %103, %105 : vector<8x32xf32>
    %107 = math.tanh %106 : vector<8x32xf32>
    %cst_43 = arith.constant 1.000000e+00 : f32
    %108 = vector.broadcast %cst_43 : f32 to vector<8x32xf32>
    %109 = arith.subf %108, %102 : vector<8x32xf32>
    %110 = arith.mulf %109, %107 : vector<8x32xf32>
    %111 = arith.mulf %102, %78 : vector<8x32xf32>
    %112 = arith.addf %110, %111 : vector<8x32xf32>
    %c16_44 = arith.constant 16 : index
    %c0_45 = arith.constant 0 : index
    %113 = vector.load %arg13[%c16_44, %c0_45] : memref<64x32xf32, #tpu.memory_space<vmem>>, vector<8x32xf32>
    tpu.vector_store %arg13[%c16_44, %c0_45], %112 {strides = array<i32>} : memref<64x32xf32, #tpu.memory_space<vmem>>, vector<8x32xf32>,
    %c24 = arith.constant 24 : index
    %c0_46 = arith.constant 0 : index
    %114 = vector.load %arg12[%c24, %c0_46] : memref<64x96xf32, #tpu.memory_space<vmem>>, vector<8x96xf32>
    %cst_47 = arith.constant dense<0.000000e+00> : vector<8x96xf32>
    %115 = tpu.matmul %112, %7, %cst_47 {dimension_numbers = #tpu.dot_dimension_numbers<[1], [0], [0], [1], [0, 0, 1, 1], [], []>} : vector<8x32xf32>, vector<32x96xf32>, vector<8x96xf32> -> vector<8x96xf32>
    %116 = arith.addf %115, %10 : vector<8x96xf32>
    %117 = vector.extract_strided_slice %114 {offsets = [0, 0], sizes = [8, 32], strides = [1, 1]} : vector<8x96xf32> to vector<8x32xf32>
    %118 = vector.extract_strided_slice %116 {offsets = [0, 0], sizes = [8, 32], strides = [1, 1]} : vector<8x96xf32> to vector<8x32xf32>
    %119 = arith.addf %117, %118 : vector<8x32xf32>
    %cst_48 = arith.constant 5.000000e-01 : f32
    %120 = vector.broadcast %cst_48 : f32 to vector<8x32xf32>
    %121 = arith.mulf %120, %119 : vector<8x32xf32>
    %122 = math.tanh %121 : vector<8x32xf32>
    %cst_49 = arith.constant 1.000000e+00 : f32
    %123 = vector.broadcast %cst_49 : f32 to vector<8x32xf32>
    %124 = arith.addf %122, %123 : vector<8x32xf32>
    %cst_50 = arith.constant 5.000000e-01 : f32
    %125 = vector.broadcast %cst_50 : f32 to vector<8x32xf32>
    %126 = arith.mulf %125, %124 : vector<8x32xf32>
    %127 = vector.extract_strided_slice %114 {offsets = [0, 32], sizes = [8, 32], strides = [1, 1]} : vector<8x96xf32> to vector<8x32xf32>
    %128 = vector.extract_strided_slice %116 {offsets = [0, 32], sizes = [8, 32], strides = [1, 1]} : vector<8x96xf32> to vector<8x32xf32>
    %129 = arith.addf %127, %128 : vector<8x32xf32>
    %cst_51 = arith.constant 5.000000e-01 : f32
    %130 = vector.broadcast %cst_51 : f32 to vector<8x32xf32>
    %131 = arith.mulf %130, %129 : vector<8x32xf32>
    %132 = math.tanh %131 : vector<8x32xf32>
    %cst_52 = arith.constant 1.000000e+00 : f32
    %133 = vector.broadcast %cst_52 : f32 to vector<8x32xf32>
    %134 = arith.addf %132, %133 : vector<8x32xf32>
    %cst_53 = arith.constant 5.000000e-01 : f32
    %135 = vector.broadcast %cst_53 : f32 to vector<8x32xf32>
    %136 = arith.mulf %135, %134 : vector<8x32xf32>
    %137 = vector.extract_strided_slice %114 {offsets = [0, 64], sizes = [8, 32], strides = [1, 1]} : vector<8x96xf32> to vector<8x32xf32>
    %138 = vector.extract_strided_slice %116 {offsets = [0, 64], sizes = [8, 32], strides = [1, 1]} : vector<8x96xf32> to vector<8x32xf32>
    %139 = arith.mulf %126, %138 : vector<8x32xf32>
    %140 = arith.addf %137, %139 : vector<8x32xf32>
    %141 = math.tanh %140 : vector<8x32xf32>
    %cst_54 = arith.constant 1.000000e+00 : f32
    %142 = vector.broadcast %cst_54 : f32 to vector<8x32xf32>
    %143 = arith.subf %142, %136 : vector<8x32xf32>
    %144 = arith.mulf %143, %141 : vector<8x32xf32>
    %145 = arith.mulf %136, %112 : vector<8x32xf32>
    %146 = arith.addf %144, %145 : vector<8x32xf32>
    %c24_55 = arith.constant 24 : index
    %c0_56 = arith.constant 0 : index
    %147 = vector.load %arg13[%c24_55, %c0_56] : memref<64x32xf32, #tpu.memory_space<vmem>>, vector<8x32xf32>
    tpu.vector_store %arg13[%c24_55, %c0_56], %146 {strides = array<i32>} : memref<64x32xf32, #tpu.memory_space<vmem>>, vector<8x32xf32>,
    %c32 = arith.constant 32 : index
    %c0_57 = arith.constant 0 : index
    %148 = vector.load %arg12[%c32, %c0_57] : memref<64x96xf32, #tpu.memory_space<vmem>>, vector<8x96xf32>
    %cst_58 = arith.constant dense<0.000000e+00> : vector<8x96xf32>
    %149 = tpu.matmul %146, %7, %cst_58 {dimension_numbers = #tpu.dot_dimension_numbers<[1], [0], [0], [1], [0, 0, 1, 1], [], []>} : vector<8x32xf32>, vector<32x96xf32>, vector<8x96xf32> -> vector<8x96xf32>
    %150 = arith.addf %149, %10 : vector<8x96xf32>
    %151 = vector.extract_strided_slice %148 {offsets = [0, 0], sizes = [8, 32], strides = [1, 1]} : vector<8x96xf32> to vector<8x32xf32>
    %152 = vector.extract_strided_slice %150 {offsets = [0, 0], sizes = [8, 32], strides = [1, 1]} : vector<8x96xf32> to vector<8x32xf32>
    %153 = arith.addf %151, %152 : vector<8x32xf32>
    %cst_59 = arith.constant 5.000000e-01 : f32
    %154 = vector.broadcast %cst_59 : f32 to vector<8x32xf32>
    %155 = arith.mulf %154, %153 : vector<8x32xf32>
    %156 = math.tanh %155 : vector<8x32xf32>
    %cst_60 = arith.constant 1.000000e+00 : f32
    %157 = vector.broadcast %cst_60 : f32 to vector<8x32xf32>
    %158 = arith.addf %156, %157 : vector<8x32xf32>
    %cst_61 = arith.constant 5.000000e-01 : f32
    %159 = vector.broadcast %cst_61 : f32 to vector<8x32xf32>
    %160 = arith.mulf %159, %158 : vector<8x32xf32>
    %161 = vector.extract_strided_slice %148 {offsets = [0, 32], sizes = [8, 32], strides = [1, 1]} : vector<8x96xf32> to vector<8x32xf32>
    %162 = vector.extract_strided_slice %150 {offsets = [0, 32], sizes = [8, 32], strides = [1, 1]} : vector<8x96xf32> to vector<8x32xf32>
    %163 = arith.addf %161, %162 : vector<8x32xf32>
    %cst_62 = arith.constant 5.000000e-01 : f32
    %164 = vector.broadcast %cst_62 : f32 to vector<8x32xf32>
    %165 = arith.mulf %164, %163 : vector<8x32xf32>
    %166 = math.tanh %165 : vector<8x32xf32>
    %cst_63 = arith.constant 1.000000e+00 : f32
    %167 = vector.broadcast %cst_63 : f32 to vector<8x32xf32>
    %168 = arith.addf %166, %167 : vector<8x32xf32>
    %cst_64 = arith.constant 5.000000e-01 : f32
    %169 = vector.broadcast %cst_64 : f32 to vector<8x32xf32>
    %170 = arith.mulf %169, %168 : vector<8x32xf32>
    %171 = vector.extract_strided_slice %148 {offsets = [0, 64], sizes = [8, 32], strides = [1, 1]} : vector<8x96xf32> to vector<8x32xf32>
    %172 = vector.extract_strided_slice %150 {offsets = [0, 64], sizes = [8, 32], strides = [1, 1]} : vector<8x96xf32> to vector<8x32xf32>
    %173 = arith.mulf %160, %172 : vector<8x32xf32>
    %174 = arith.addf %171, %173 : vector<8x32xf32>
    %175 = math.tanh %174 : vector<8x32xf32>
    %cst_65 = arith.constant 1.000000e+00 : f32
    %176 = vector.broadcast %cst_65 : f32 to vector<8x32xf32>
    %177 = arith.subf %176, %170 : vector<8x32xf32>
    %178 = arith.mulf %177, %175 : vector<8x32xf32>
    %179 = arith.mulf %170, %146 : vector<8x32xf32>
    %180 = arith.addf %178, %179 : vector<8x32xf32>
    %c32_66 = arith.constant 32 : index
    %c0_67 = arith.constant 0 : index
    %181 = vector.load %arg13[%c32_66, %c0_67] : memref<64x32xf32, #tpu.memory_space<vmem>>, vector<8x32xf32>
    tpu.vector_store %arg13[%c32_66, %c0_67], %180 {strides = array<i32>} : memref<64x32xf32, #tpu.memory_space<vmem>>, vector<8x32xf32>,
    %c40 = arith.constant 40 : index
    %c0_68 = arith.constant 0 : index
    %182 = vector.load %arg12[%c40, %c0_68] : memref<64x96xf32, #tpu.memory_space<vmem>>, vector<8x96xf32>
    %cst_69 = arith.constant dense<0.000000e+00> : vector<8x96xf32>
    %183 = tpu.matmul %180, %7, %cst_69 {dimension_numbers = #tpu.dot_dimension_numbers<[1], [0], [0], [1], [0, 0, 1, 1], [], []>} : vector<8x32xf32>, vector<32x96xf32>, vector<8x96xf32> -> vector<8x96xf32>
    %184 = arith.addf %183, %10 : vector<8x96xf32>
    %185 = vector.extract_strided_slice %182 {offsets = [0, 0], sizes = [8, 32], strides = [1, 1]} : vector<8x96xf32> to vector<8x32xf32>
    %186 = vector.extract_strided_slice %184 {offsets = [0, 0], sizes = [8, 32], strides = [1, 1]} : vector<8x96xf32> to vector<8x32xf32>
    %187 = arith.addf %185, %186 : vector<8x32xf32>
    %cst_70 = arith.constant 5.000000e-01 : f32
    %188 = vector.broadcast %cst_70 : f32 to vector<8x32xf32>
    %189 = arith.mulf %188, %187 : vector<8x32xf32>
    %190 = math.tanh %189 : vector<8x32xf32>
    %cst_71 = arith.constant 1.000000e+00 : f32
    %191 = vector.broadcast %cst_71 : f32 to vector<8x32xf32>
    %192 = arith.addf %190, %191 : vector<8x32xf32>
    %cst_72 = arith.constant 5.000000e-01 : f32
    %193 = vector.broadcast %cst_72 : f32 to vector<8x32xf32>
    %194 = arith.mulf %193, %192 : vector<8x32xf32>
    %195 = vector.extract_strided_slice %182 {offsets = [0, 32], sizes = [8, 32], strides = [1, 1]} : vector<8x96xf32> to vector<8x32xf32>
    %196 = vector.extract_strided_slice %184 {offsets = [0, 32], sizes = [8, 32], strides = [1, 1]} : vector<8x96xf32> to vector<8x32xf32>
    %197 = arith.addf %195, %196 : vector<8x32xf32>
    %cst_73 = arith.constant 5.000000e-01 : f32
    %198 = vector.broadcast %cst_73 : f32 to vector<8x32xf32>
    %199 = arith.mulf %198, %197 : vector<8x32xf32>
    %200 = math.tanh %199 : vector<8x32xf32>
    %cst_74 = arith.constant 1.000000e+00 : f32
    %201 = vector.broadcast %cst_74 : f32 to vector<8x32xf32>
    %202 = arith.addf %200, %201 : vector<8x32xf32>
    %cst_75 = arith.constant 5.000000e-01 : f32
    %203 = vector.broadcast %cst_75 : f32 to vector<8x32xf32>
    %204 = arith.mulf %203, %202 : vector<8x32xf32>
    %205 = vector.extract_strided_slice %182 {offsets = [0, 64], sizes = [8, 32], strides = [1, 1]} : vector<8x96xf32> to vector<8x32xf32>
    %206 = vector.extract_strided_slice %184 {offsets = [0, 64], sizes = [8, 32], strides = [1, 1]} : vector<8x96xf32> to vector<8x32xf32>
    %207 = arith.mulf %194, %206 : vector<8x32xf32>
    %208 = arith.addf %205, %207 : vector<8x32xf32>
    %209 = math.tanh %208 : vector<8x32xf32>
    %cst_76 = arith.constant 1.000000e+00 : f32
    %210 = vector.broadcast %cst_76 : f32 to vector<8x32xf32>
    %211 = arith.subf %210, %204 : vector<8x32xf32>
    %212 = arith.mulf %211, %209 : vector<8x32xf32>
    %213 = arith.mulf %204, %180 : vector<8x32xf32>
    %214 = arith.addf %212, %213 : vector<8x32xf32>
    %c40_77 = arith.constant 40 : index
    %c0_78 = arith.constant 0 : index
    %215 = vector.load %arg13[%c40_77, %c0_78] : memref<64x32xf32, #tpu.memory_space<vmem>>, vector<8x32xf32>
    tpu.vector_store %arg13[%c40_77, %c0_78], %214 {strides = array<i32>} : memref<64x32xf32, #tpu.memory_space<vmem>>, vector<8x32xf32>,
    %c48 = arith.constant 48 : index
    %c0_79 = arith.constant 0 : index
    %216 = vector.load %arg12[%c48, %c0_79] : memref<64x96xf32, #tpu.memory_space<vmem>>, vector<8x96xf32>
    %cst_80 = arith.constant dense<0.000000e+00> : vector<8x96xf32>
    %217 = tpu.matmul %214, %7, %cst_80 {dimension_numbers = #tpu.dot_dimension_numbers<[1], [0], [0], [1], [0, 0, 1, 1], [], []>} : vector<8x32xf32>, vector<32x96xf32>, vector<8x96xf32> -> vector<8x96xf32>
    %218 = arith.addf %217, %10 : vector<8x96xf32>
    %219 = vector.extract_strided_slice %216 {offsets = [0, 0], sizes = [8, 32], strides = [1, 1]} : vector<8x96xf32> to vector<8x32xf32>
    %220 = vector.extract_strided_slice %218 {offsets = [0, 0], sizes = [8, 32], strides = [1, 1]} : vector<8x96xf32> to vector<8x32xf32>
    %221 = arith.addf %219, %220 : vector<8x32xf32>
    %cst_81 = arith.constant 5.000000e-01 : f32
    %222 = vector.broadcast %cst_81 : f32 to vector<8x32xf32>
    %223 = arith.mulf %222, %221 : vector<8x32xf32>
    %224 = math.tanh %223 : vector<8x32xf32>
    %cst_82 = arith.constant 1.000000e+00 : f32
    %225 = vector.broadcast %cst_82 : f32 to vector<8x32xf32>
    %226 = arith.addf %224, %225 : vector<8x32xf32>
    %cst_83 = arith.constant 5.000000e-01 : f32
    %227 = vector.broadcast %cst_83 : f32 to vector<8x32xf32>
    %228 = arith.mulf %227, %226 : vector<8x32xf32>
    %229 = vector.extract_strided_slice %216 {offsets = [0, 32], sizes = [8, 32], strides = [1, 1]} : vector<8x96xf32> to vector<8x32xf32>
    %230 = vector.extract_strided_slice %218 {offsets = [0, 32], sizes = [8, 32], strides = [1, 1]} : vector<8x96xf32> to vector<8x32xf32>
    %231 = arith.addf %229, %230 : vector<8x32xf32>
    %cst_84 = arith.constant 5.000000e-01 : f32
    %232 = vector.broadcast %cst_84 : f32 to vector<8x32xf32>
    %233 = arith.mulf %232, %231 : vector<8x32xf32>
    %234 = math.tanh %233 : vector<8x32xf32>
    %cst_85 = arith.constant 1.000000e+00 : f32
    %235 = vector.broadcast %cst_85 : f32 to vector<8x32xf32>
    %236 = arith.addf %234, %235 : vector<8x32xf32>
    %cst_86 = arith.constant 5.000000e-01 : f32
    %237 = vector.broadcast %cst_86 : f32 to vector<8x32xf32>
    %238 = arith.mulf %237, %236 : vector<8x32xf32>
    %239 = vector.extract_strided_slice %216 {offsets = [0, 64], sizes = [8, 32], strides = [1, 1]} : vector<8x96xf32> to vector<8x32xf32>
    %240 = vector.extract_strided_slice %218 {offsets = [0, 64], sizes = [8, 32], strides = [1, 1]} : vector<8x96xf32> to vector<8x32xf32>
    %241 = arith.mulf %228, %240 : vector<8x32xf32>
    %242 = arith.addf %239, %241 : vector<8x32xf32>
    %243 = math.tanh %242 : vector<8x32xf32>
    %cst_87 = arith.constant 1.000000e+00 : f32
    %244 = vector.broadcast %cst_87 : f32 to vector<8x32xf32>
    %245 = arith.subf %244, %238 : vector<8x32xf32>
    %246 = arith.mulf %245, %243 : vector<8x32xf32>
    %247 = arith.mulf %238, %214 : vector<8x32xf32>
    %248 = arith.addf %246, %247 : vector<8x32xf32>
    %c48_88 = arith.constant 48 : index
    %c0_89 = arith.constant 0 : index
    %249 = vector.load %arg13[%c48_88, %c0_89] : memref<64x32xf32, #tpu.memory_space<vmem>>, vector<8x32xf32>
    tpu.vector_store %arg13[%c48_88, %c0_89], %248 {strides = array<i32>} : memref<64x32xf32, #tpu.memory_space<vmem>>, vector<8x32xf32>,
    %c56 = arith.constant 56 : index
    %c0_90 = arith.constant 0 : index
    %250 = vector.load %arg12[%c56, %c0_90] : memref<64x96xf32, #tpu.memory_space<vmem>>, vector<8x96xf32>
    %cst_91 = arith.constant dense<0.000000e+00> : vector<8x96xf32>
    %251 = tpu.matmul %248, %7, %cst_91 {dimension_numbers = #tpu.dot_dimension_numbers<[1], [0], [0], [1], [0, 0, 1, 1], [], []>} : vector<8x32xf32>, vector<32x96xf32>, vector<8x96xf32> -> vector<8x96xf32>
    %252 = arith.addf %251, %10 : vector<8x96xf32>
    %253 = vector.extract_strided_slice %250 {offsets = [0, 0], sizes = [8, 32], strides = [1, 1]} : vector<8x96xf32> to vector<8x32xf32>
    %254 = vector.extract_strided_slice %252 {offsets = [0, 0], sizes = [8, 32], strides = [1, 1]} : vector<8x96xf32> to vector<8x32xf32>
    %255 = arith.addf %253, %254 : vector<8x32xf32>
    %cst_92 = arith.constant 5.000000e-01 : f32
    %256 = vector.broadcast %cst_92 : f32 to vector<8x32xf32>
    %257 = arith.mulf %256, %255 : vector<8x32xf32>
    %258 = math.tanh %257 : vector<8x32xf32>
    %cst_93 = arith.constant 1.000000e+00 : f32
    %259 = vector.broadcast %cst_93 : f32 to vector<8x32xf32>
    %260 = arith.addf %258, %259 : vector<8x32xf32>
    %cst_94 = arith.constant 5.000000e-01 : f32
    %261 = vector.broadcast %cst_94 : f32 to vector<8x32xf32>
    %262 = arith.mulf %261, %260 : vector<8x32xf32>
    %263 = vector.extract_strided_slice %250 {offsets = [0, 32], sizes = [8, 32], strides = [1, 1]} : vector<8x96xf32> to vector<8x32xf32>
    %264 = vector.extract_strided_slice %252 {offsets = [0, 32], sizes = [8, 32], strides = [1, 1]} : vector<8x96xf32> to vector<8x32xf32>
    %265 = arith.addf %263, %264 : vector<8x32xf32>
    %cst_95 = arith.constant 5.000000e-01 : f32
    %266 = vector.broadcast %cst_95 : f32 to vector<8x32xf32>
    %267 = arith.mulf %266, %265 : vector<8x32xf32>
    %268 = math.tanh %267 : vector<8x32xf32>
    %cst_96 = arith.constant 1.000000e+00 : f32
    %269 = vector.broadcast %cst_96 : f32 to vector<8x32xf32>
    %270 = arith.addf %268, %269 : vector<8x32xf32>
    %cst_97 = arith.constant 5.000000e-01 : f32
    %271 = vector.broadcast %cst_97 : f32 to vector<8x32xf32>
    %272 = arith.mulf %271, %270 : vector<8x32xf32>
    %273 = vector.extract_strided_slice %250 {offsets = [0, 64], sizes = [8, 32], strides = [1, 1]} : vector<8x96xf32> to vector<8x32xf32>
    %274 = vector.extract_strided_slice %252 {offsets = [0, 64], sizes = [8, 32], strides = [1, 1]} : vector<8x96xf32> to vector<8x32xf32>
    %275 = arith.mulf %262, %274 : vector<8x32xf32>
    %276 = arith.addf %273, %275 : vector<8x32xf32>
    %277 = math.tanh %276 : vector<8x32xf32>
    %cst_98 = arith.constant 1.000000e+00 : f32
    %278 = vector.broadcast %cst_98 : f32 to vector<8x32xf32>
    %279 = arith.subf %278, %272 : vector<8x32xf32>
    %280 = arith.mulf %279, %277 : vector<8x32xf32>
    %281 = arith.mulf %272, %248 : vector<8x32xf32>
    %282 = arith.addf %280, %281 : vector<8x32xf32>
    %c56_99 = arith.constant 56 : index
    %c0_100 = arith.constant 0 : index
    %283 = vector.load %arg13[%c56_99, %c0_100] : memref<64x32xf32, #tpu.memory_space<vmem>>, vector<8x32xf32>
    tpu.vector_store %arg13[%c56_99, %c0_100], %282 {strides = array<i32>} : memref<64x32xf32, #tpu.memory_space<vmem>>, vector<8x32xf32>,
    %c0_101 = arith.constant 0 : index
    %c0_102 = arith.constant 0 : index
    %284 = vector.load %arg13[%c0_101, %c0_102] : memref<64x32xf32, #tpu.memory_space<vmem>>, vector<64x32xf32>
    %c0_103 = arith.constant 0 : index
    %c0_104 = arith.constant 0 : index
    %285 = vector.load %arg5[%c0_103, %c0_104] : memref<32x96xf32, #tpu.memory_space<vmem>>, vector<32x96xf32>
    %cst_105 = arith.constant dense<0.000000e+00> : vector<64x96xf32>
    %286 = tpu.matmul %284, %285, %cst_105 {dimension_numbers = #tpu.dot_dimension_numbers<[1], [0], [0], [1], [0, 0, 1, 1], [], []>} : vector<64x32xf32>, vector<32x96xf32>, vector<64x96xf32> -> vector<64x96xf32>
    %c0_106 = arith.constant 0 : index
    %c0_107 = arith.constant 0 : index
    %287 = vector.load %arg7[%c0_106, %c0_107] : memref<1x96xf32, #tpu.memory_space<vmem>>, vector<1x96xf32>
    %288 = vector.broadcast %287 : vector<1x96xf32> to vector<64x96xf32>
    %289 = arith.addf %286, %288 : vector<64x96xf32>
    %c0_108 = arith.constant 0 : index
    %c0_109 = arith.constant 0 : index
    %290 = vector.load %arg12[%c0_108, %c0_109] : memref<64x96xf32, #tpu.memory_space<vmem>>, vector<64x96xf32>
    tpu.vector_store %arg12[%c0_108, %c0_109], %289 {strides = array<i32>} : memref<64x96xf32, #tpu.memory_space<vmem>>, vector<64x96xf32>,
    %c0_110 = arith.constant 0 : index
    %c0_111 = arith.constant 0 : index
    %291 = vector.load %arg6[%c0_110, %c0_111] : memref<32x96xf32, #tpu.memory_space<vmem>>, vector<32x96xf32>
    %c0_112 = arith.constant 0 : index
    %c0_113 = arith.constant 0 : index
    %292 = vector.load %arg8[%c0_112, %c0_113] : memref<1x96xf32, #tpu.memory_space<vmem>>, vector<1x96xf32>
    %293 = vector.shape_cast %292 : vector<1x96xf32> to vector<1x96xf32>
    %294 = vector.broadcast %293 : vector<1x96xf32> to vector<8x96xf32>
    %cst_114 = arith.constant 0.000000e+00 : f32
    %295 = vector.broadcast %cst_114 : f32 to vector<8x32xf32>
    %c0_115 = arith.constant 0 : index
    %c0_116 = arith.constant 0 : index
    %296 = vector.load %arg12[%c0_115, %c0_116] : memref<64x96xf32, #tpu.memory_space<vmem>>, vector<8x96xf32>
    %cst_117 = arith.constant dense<0.000000e+00> : vector<8x96xf32>
    %297 = tpu.matmul %295, %291, %cst_117 {dimension_numbers = #tpu.dot_dimension_numbers<[1], [0], [0], [1], [0, 0, 1, 1], [], []>} : vector<8x32xf32>, vector<32x96xf32>, vector<8x96xf32> -> vector<8x96xf32>
    %298 = arith.addf %297, %294 : vector<8x96xf32>
    %299 = vector.extract_strided_slice %296 {offsets = [0, 0], sizes = [8, 32], strides = [1, 1]} : vector<8x96xf32> to vector<8x32xf32>
    %300 = vector.extract_strided_slice %298 {offsets = [0, 0], sizes = [8, 32], strides = [1, 1]} : vector<8x96xf32> to vector<8x32xf32>
    %301 = arith.addf %299, %300 : vector<8x32xf32>
    %cst_118 = arith.constant 5.000000e-01 : f32
    %302 = vector.broadcast %cst_118 : f32 to vector<8x32xf32>
    %303 = arith.mulf %302, %301 : vector<8x32xf32>
    %304 = math.tanh %303 : vector<8x32xf32>
    %cst_119 = arith.constant 1.000000e+00 : f32
    %305 = vector.broadcast %cst_119 : f32 to vector<8x32xf32>
    %306 = arith.addf %304, %305 : vector<8x32xf32>
    %cst_120 = arith.constant 5.000000e-01 : f32
    %307 = vector.broadcast %cst_120 : f32 to vector<8x32xf32>
    %308 = arith.mulf %307, %306 : vector<8x32xf32>
    %309 = vector.extract_strided_slice %296 {offsets = [0, 32], sizes = [8, 32], strides = [1, 1]} : vector<8x96xf32> to vector<8x32xf32>
    %310 = vector.extract_strided_slice %298 {offsets = [0, 32], sizes = [8, 32], strides = [1, 1]} : vector<8x96xf32> to vector<8x32xf32>
    %311 = arith.addf %309, %310 : vector<8x32xf32>
    %cst_121 = arith.constant 5.000000e-01 : f32
    %312 = vector.broadcast %cst_121 : f32 to vector<8x32xf32>
    %313 = arith.mulf %312, %311 : vector<8x32xf32>
    %314 = math.tanh %313 : vector<8x32xf32>
    %cst_122 = arith.constant 1.000000e+00 : f32
    %315 = vector.broadcast %cst_122 : f32 to vector<8x32xf32>
    %316 = arith.addf %314, %315 : vector<8x32xf32>
    %cst_123 = arith.constant 5.000000e-01 : f32
    %317 = vector.broadcast %cst_123 : f32 to vector<8x32xf32>
    %318 = arith.mulf %317, %316 : vector<8x32xf32>
    %319 = vector.extract_strided_slice %296 {offsets = [0, 64], sizes = [8, 32], strides = [1, 1]} : vector<8x96xf32> to vector<8x32xf32>
    %320 = vector.extract_strided_slice %298 {offsets = [0, 64], sizes = [8, 32], strides = [1, 1]} : vector<8x96xf32> to vector<8x32xf32>
    %321 = arith.mulf %308, %320 : vector<8x32xf32>
    %322 = arith.addf %319, %321 : vector<8x32xf32>
    %323 = math.tanh %322 : vector<8x32xf32>
    %cst_124 = arith.constant 1.000000e+00 : f32
    %324 = vector.broadcast %cst_124 : f32 to vector<8x32xf32>
    %325 = arith.subf %324, %318 : vector<8x32xf32>
    %326 = arith.mulf %325, %323 : vector<8x32xf32>
    %327 = arith.mulf %318, %295 : vector<8x32xf32>
    %328 = arith.addf %326, %327 : vector<8x32xf32>
    %c0_125 = arith.constant 0 : index
    %c0_126 = arith.constant 0 : index
    %329 = vector.load %arg13[%c0_125, %c0_126] : memref<64x32xf32, #tpu.memory_space<vmem>>, vector<8x32xf32>
    tpu.vector_store %arg13[%c0_125, %c0_126], %328 {strides = array<i32>} : memref<64x32xf32, #tpu.memory_space<vmem>>, vector<8x32xf32>,
    %c8_127 = arith.constant 8 : index
    %c0_128 = arith.constant 0 : index
    %330 = vector.load %arg12[%c8_127, %c0_128] : memref<64x96xf32, #tpu.memory_space<vmem>>, vector<8x96xf32>
    %cst_129 = arith.constant dense<0.000000e+00> : vector<8x96xf32>
    %331 = tpu.matmul %328, %291, %cst_129 {dimension_numbers = #tpu.dot_dimension_numbers<[1], [0], [0], [1], [0, 0, 1, 1], [], []>} : vector<8x32xf32>, vector<32x96xf32>, vector<8x96xf32> -> vector<8x96xf32>
    %332 = arith.addf %331, %294 : vector<8x96xf32>
    %333 = vector.extract_strided_slice %330 {offsets = [0, 0], sizes = [8, 32], strides = [1, 1]} : vector<8x96xf32> to vector<8x32xf32>
    %334 = vector.extract_strided_slice %332 {offsets = [0, 0], sizes = [8, 32], strides = [1, 1]} : vector<8x96xf32> to vector<8x32xf32>
    %335 = arith.addf %333, %334 : vector<8x32xf32>
    %cst_130 = arith.constant 5.000000e-01 : f32
    %336 = vector.broadcast %cst_130 : f32 to vector<8x32xf32>
    %337 = arith.mulf %336, %335 : vector<8x32xf32>
    %338 = math.tanh %337 : vector<8x32xf32>
    %cst_131 = arith.constant 1.000000e+00 : f32
    %339 = vector.broadcast %cst_131 : f32 to vector<8x32xf32>
    %340 = arith.addf %338, %339 : vector<8x32xf32>
    %cst_132 = arith.constant 5.000000e-01 : f32
    %341 = vector.broadcast %cst_132 : f32 to vector<8x32xf32>
    %342 = arith.mulf %341, %340 : vector<8x32xf32>
    %343 = vector.extract_strided_slice %330 {offsets = [0, 32], sizes = [8, 32], strides = [1, 1]} : vector<8x96xf32> to vector<8x32xf32>
    %344 = vector.extract_strided_slice %332 {offsets = [0, 32], sizes = [8, 32], strides = [1, 1]} : vector<8x96xf32> to vector<8x32xf32>
    %345 = arith.addf %343, %344 : vector<8x32xf32>
    %cst_133 = arith.constant 5.000000e-01 : f32
    %346 = vector.broadcast %cst_133 : f32 to vector<8x32xf32>
    %347 = arith.mulf %346, %345 : vector<8x32xf32>
    %348 = math.tanh %347 : vector<8x32xf32>
    %cst_134 = arith.constant 1.000000e+00 : f32
    %349 = vector.broadcast %cst_134 : f32 to vector<8x32xf32>
    %350 = arith.addf %348, %349 : vector<8x32xf32>
    %cst_135 = arith.constant 5.000000e-01 : f32
    %351 = vector.broadcast %cst_135 : f32 to vector<8x32xf32>
    %352 = arith.mulf %351, %350 : vector<8x32xf32>
    %353 = vector.extract_strided_slice %330 {offsets = [0, 64], sizes = [8, 32], strides = [1, 1]} : vector<8x96xf32> to vector<8x32xf32>
    %354 = vector.extract_strided_slice %332 {offsets = [0, 64], sizes = [8, 32], strides = [1, 1]} : vector<8x96xf32> to vector<8x32xf32>
    %355 = arith.mulf %342, %354 : vector<8x32xf32>
    %356 = arith.addf %353, %355 : vector<8x32xf32>
    %357 = math.tanh %356 : vector<8x32xf32>
    %cst_136 = arith.constant 1.000000e+00 : f32
    %358 = vector.broadcast %cst_136 : f32 to vector<8x32xf32>
    %359 = arith.subf %358, %352 : vector<8x32xf32>
    %360 = arith.mulf %359, %357 : vector<8x32xf32>
    %361 = arith.mulf %352, %328 : vector<8x32xf32>
    %362 = arith.addf %360, %361 : vector<8x32xf32>
    %c8_137 = arith.constant 8 : index
    %c0_138 = arith.constant 0 : index
    %363 = vector.load %arg13[%c8_137, %c0_138] : memref<64x32xf32, #tpu.memory_space<vmem>>, vector<8x32xf32>
    tpu.vector_store %arg13[%c8_137, %c0_138], %362 {strides = array<i32>} : memref<64x32xf32, #tpu.memory_space<vmem>>, vector<8x32xf32>,
    %c16_139 = arith.constant 16 : index
    %c0_140 = arith.constant 0 : index
    %364 = vector.load %arg12[%c16_139, %c0_140] : memref<64x96xf32, #tpu.memory_space<vmem>>, vector<8x96xf32>
    %cst_141 = arith.constant dense<0.000000e+00> : vector<8x96xf32>
    %365 = tpu.matmul %362, %291, %cst_141 {dimension_numbers = #tpu.dot_dimension_numbers<[1], [0], [0], [1], [0, 0, 1, 1], [], []>} : vector<8x32xf32>, vector<32x96xf32>, vector<8x96xf32> -> vector<8x96xf32>
    %366 = arith.addf %365, %294 : vector<8x96xf32>
    %367 = vector.extract_strided_slice %364 {offsets = [0, 0], sizes = [8, 32], strides = [1, 1]} : vector<8x96xf32> to vector<8x32xf32>
    %368 = vector.extract_strided_slice %366 {offsets = [0, 0], sizes = [8, 32], strides = [1, 1]} : vector<8x96xf32> to vector<8x32xf32>
    %369 = arith.addf %367, %368 : vector<8x32xf32>
    %cst_142 = arith.constant 5.000000e-01 : f32
    %370 = vector.broadcast %cst_142 : f32 to vector<8x32xf32>
    %371 = arith.mulf %370, %369 : vector<8x32xf32>
    %372 = math.tanh %371 : vector<8x32xf32>
    %cst_143 = arith.constant 1.000000e+00 : f32
    %373 = vector.broadcast %cst_143 : f32 to vector<8x32xf32>
    %374 = arith.addf %372, %373 : vector<8x32xf32>
    %cst_144 = arith.constant 5.000000e-01 : f32
    %375 = vector.broadcast %cst_144 : f32 to vector<8x32xf32>
    %376 = arith.mulf %375, %374 : vector<8x32xf32>
    %377 = vector.extract_strided_slice %364 {offsets = [0, 32], sizes = [8, 32], strides = [1, 1]} : vector<8x96xf32> to vector<8x32xf32>
    %378 = vector.extract_strided_slice %366 {offsets = [0, 32], sizes = [8, 32], strides = [1, 1]} : vector<8x96xf32> to vector<8x32xf32>
    %379 = arith.addf %377, %378 : vector<8x32xf32>
    %cst_145 = arith.constant 5.000000e-01 : f32
    %380 = vector.broadcast %cst_145 : f32 to vector<8x32xf32>
    %381 = arith.mulf %380, %379 : vector<8x32xf32>
    %382 = math.tanh %381 : vector<8x32xf32>
    %cst_146 = arith.constant 1.000000e+00 : f32
    %383 = vector.broadcast %cst_146 : f32 to vector<8x32xf32>
    %384 = arith.addf %382, %383 : vector<8x32xf32>
    %cst_147 = arith.constant 5.000000e-01 : f32
    %385 = vector.broadcast %cst_147 : f32 to vector<8x32xf32>
    %386 = arith.mulf %385, %384 : vector<8x32xf32>
    %387 = vector.extract_strided_slice %364 {offsets = [0, 64], sizes = [8, 32], strides = [1, 1]} : vector<8x96xf32> to vector<8x32xf32>
    %388 = vector.extract_strided_slice %366 {offsets = [0, 64], sizes = [8, 32], strides = [1, 1]} : vector<8x96xf32> to vector<8x32xf32>
    %389 = arith.mulf %376, %388 : vector<8x32xf32>
    %390 = arith.addf %387, %389 : vector<8x32xf32>
    %391 = math.tanh %390 : vector<8x32xf32>
    %cst_148 = arith.constant 1.000000e+00 : f32
    %392 = vector.broadcast %cst_148 : f32 to vector<8x32xf32>
    %393 = arith.subf %392, %386 : vector<8x32xf32>
    %394 = arith.mulf %393, %391 : vector<8x32xf32>
    %395 = arith.mulf %386, %362 : vector<8x32xf32>
    %396 = arith.addf %394, %395 : vector<8x32xf32>
    %c16_149 = arith.constant 16 : index
    %c0_150 = arith.constant 0 : index
    %397 = vector.load %arg13[%c16_149, %c0_150] : memref<64x32xf32, #tpu.memory_space<vmem>>, vector<8x32xf32>
    tpu.vector_store %arg13[%c16_149, %c0_150], %396 {strides = array<i32>} : memref<64x32xf32, #tpu.memory_space<vmem>>, vector<8x32xf32>,
    %c24_151 = arith.constant 24 : index
    %c0_152 = arith.constant 0 : index
    %398 = vector.load %arg12[%c24_151, %c0_152] : memref<64x96xf32, #tpu.memory_space<vmem>>, vector<8x96xf32>
    %cst_153 = arith.constant dense<0.000000e+00> : vector<8x96xf32>
    %399 = tpu.matmul %396, %291, %cst_153 {dimension_numbers = #tpu.dot_dimension_numbers<[1], [0], [0], [1], [0, 0, 1, 1], [], []>} : vector<8x32xf32>, vector<32x96xf32>, vector<8x96xf32> -> vector<8x96xf32>
    %400 = arith.addf %399, %294 : vector<8x96xf32>
    %401 = vector.extract_strided_slice %398 {offsets = [0, 0], sizes = [8, 32], strides = [1, 1]} : vector<8x96xf32> to vector<8x32xf32>
    %402 = vector.extract_strided_slice %400 {offsets = [0, 0], sizes = [8, 32], strides = [1, 1]} : vector<8x96xf32> to vector<8x32xf32>
    %403 = arith.addf %401, %402 : vector<8x32xf32>
    %cst_154 = arith.constant 5.000000e-01 : f32
    %404 = vector.broadcast %cst_154 : f32 to vector<8x32xf32>
    %405 = arith.mulf %404, %403 : vector<8x32xf32>
    %406 = math.tanh %405 : vector<8x32xf32>
    %cst_155 = arith.constant 1.000000e+00 : f32
    %407 = vector.broadcast %cst_155 : f32 to vector<8x32xf32>
    %408 = arith.addf %406, %407 : vector<8x32xf32>
    %cst_156 = arith.constant 5.000000e-01 : f32
    %409 = vector.broadcast %cst_156 : f32 to vector<8x32xf32>
    %410 = arith.mulf %409, %408 : vector<8x32xf32>
    %411 = vector.extract_strided_slice %398 {offsets = [0, 32], sizes = [8, 32], strides = [1, 1]} : vector<8x96xf32> to vector<8x32xf32>
    %412 = vector.extract_strided_slice %400 {offsets = [0, 32], sizes = [8, 32], strides = [1, 1]} : vector<8x96xf32> to vector<8x32xf32>
    %413 = arith.addf %411, %412 : vector<8x32xf32>
    %cst_157 = arith.constant 5.000000e-01 : f32
    %414 = vector.broadcast %cst_157 : f32 to vector<8x32xf32>
    %415 = arith.mulf %414, %413 : vector<8x32xf32>
    %416 = math.tanh %415 : vector<8x32xf32>
    %cst_158 = arith.constant 1.000000e+00 : f32
    %417 = vector.broadcast %cst_158 : f32 to vector<8x32xf32>
    %418 = arith.addf %416, %417 : vector<8x32xf32>
    %cst_159 = arith.constant 5.000000e-01 : f32
    %419 = vector.broadcast %cst_159 : f32 to vector<8x32xf32>
    %420 = arith.mulf %419, %418 : vector<8x32xf32>
    %421 = vector.extract_strided_slice %398 {offsets = [0, 64], sizes = [8, 32], strides = [1, 1]} : vector<8x96xf32> to vector<8x32xf32>
    %422 = vector.extract_strided_slice %400 {offsets = [0, 64], sizes = [8, 32], strides = [1, 1]} : vector<8x96xf32> to vector<8x32xf32>
    %423 = arith.mulf %410, %422 : vector<8x32xf32>
    %424 = arith.addf %421, %423 : vector<8x32xf32>
    %425 = math.tanh %424 : vector<8x32xf32>
    %cst_160 = arith.constant 1.000000e+00 : f32
    %426 = vector.broadcast %cst_160 : f32 to vector<8x32xf32>
    %427 = arith.subf %426, %420 : vector<8x32xf32>
    %428 = arith.mulf %427, %425 : vector<8x32xf32>
    %429 = arith.mulf %420, %396 : vector<8x32xf32>
    %430 = arith.addf %428, %429 : vector<8x32xf32>
    %c24_161 = arith.constant 24 : index
    %c0_162 = arith.constant 0 : index
    %431 = vector.load %arg13[%c24_161, %c0_162] : memref<64x32xf32, #tpu.memory_space<vmem>>, vector<8x32xf32>
    tpu.vector_store %arg13[%c24_161, %c0_162], %430 {strides = array<i32>} : memref<64x32xf32, #tpu.memory_space<vmem>>, vector<8x32xf32>,
    %c32_163 = arith.constant 32 : index
    %c0_164 = arith.constant 0 : index
    %432 = vector.load %arg12[%c32_163, %c0_164] : memref<64x96xf32, #tpu.memory_space<vmem>>, vector<8x96xf32>
    %cst_165 = arith.constant dense<0.000000e+00> : vector<8x96xf32>
    %433 = tpu.matmul %430, %291, %cst_165 {dimension_numbers = #tpu.dot_dimension_numbers<[1], [0], [0], [1], [0, 0, 1, 1], [], []>} : vector<8x32xf32>, vector<32x96xf32>, vector<8x96xf32> -> vector<8x96xf32>
    %434 = arith.addf %433, %294 : vector<8x96xf32>
    %435 = vector.extract_strided_slice %432 {offsets = [0, 0], sizes = [8, 32], strides = [1, 1]} : vector<8x96xf32> to vector<8x32xf32>
    %436 = vector.extract_strided_slice %434 {offsets = [0, 0], sizes = [8, 32], strides = [1, 1]} : vector<8x96xf32> to vector<8x32xf32>
    %437 = arith.addf %435, %436 : vector<8x32xf32>
    %cst_166 = arith.constant 5.000000e-01 : f32
    %438 = vector.broadcast %cst_166 : f32 to vector<8x32xf32>
    %439 = arith.mulf %438, %437 : vector<8x32xf32>
    %440 = math.tanh %439 : vector<8x32xf32>
    %cst_167 = arith.constant 1.000000e+00 : f32
    %441 = vector.broadcast %cst_167 : f32 to vector<8x32xf32>
    %442 = arith.addf %440, %441 : vector<8x32xf32>
    %cst_168 = arith.constant 5.000000e-01 : f32
    %443 = vector.broadcast %cst_168 : f32 to vector<8x32xf32>
    %444 = arith.mulf %443, %442 : vector<8x32xf32>
    %445 = vector.extract_strided_slice %432 {offsets = [0, 32], sizes = [8, 32], strides = [1, 1]} : vector<8x96xf32> to vector<8x32xf32>
    %446 = vector.extract_strided_slice %434 {offsets = [0, 32], sizes = [8, 32], strides = [1, 1]} : vector<8x96xf32> to vector<8x32xf32>
    %447 = arith.addf %445, %446 : vector<8x32xf32>
    %cst_169 = arith.constant 5.000000e-01 : f32
    %448 = vector.broadcast %cst_169 : f32 to vector<8x32xf32>
    %449 = arith.mulf %448, %447 : vector<8x32xf32>
    %450 = math.tanh %449 : vector<8x32xf32>
    %cst_170 = arith.constant 1.000000e+00 : f32
    %451 = vector.broadcast %cst_170 : f32 to vector<8x32xf32>
    %452 = arith.addf %450, %451 : vector<8x32xf32>
    %cst_171 = arith.constant 5.000000e-01 : f32
    %453 = vector.broadcast %cst_171 : f32 to vector<8x32xf32>
    %454 = arith.mulf %453, %452 : vector<8x32xf32>
    %455 = vector.extract_strided_slice %432 {offsets = [0, 64], sizes = [8, 32], strides = [1, 1]} : vector<8x96xf32> to vector<8x32xf32>
    %456 = vector.extract_strided_slice %434 {offsets = [0, 64], sizes = [8, 32], strides = [1, 1]} : vector<8x96xf32> to vector<8x32xf32>
    %457 = arith.mulf %444, %456 : vector<8x32xf32>
    %458 = arith.addf %455, %457 : vector<8x32xf32>
    %459 = math.tanh %458 : vector<8x32xf32>
    %cst_172 = arith.constant 1.000000e+00 : f32
    %460 = vector.broadcast %cst_172 : f32 to vector<8x32xf32>
    %461 = arith.subf %460, %454 : vector<8x32xf32>
    %462 = arith.mulf %461, %459 : vector<8x32xf32>
    %463 = arith.mulf %454, %430 : vector<8x32xf32>
    %464 = arith.addf %462, %463 : vector<8x32xf32>
    %c32_173 = arith.constant 32 : index
    %c0_174 = arith.constant 0 : index
    %465 = vector.load %arg13[%c32_173, %c0_174] : memref<64x32xf32, #tpu.memory_space<vmem>>, vector<8x32xf32>
    tpu.vector_store %arg13[%c32_173, %c0_174], %464 {strides = array<i32>} : memref<64x32xf32, #tpu.memory_space<vmem>>, vector<8x32xf32>,
    %c40_175 = arith.constant 40 : index
    %c0_176 = arith.constant 0 : index
    %466 = vector.load %arg12[%c40_175, %c0_176] : memref<64x96xf32, #tpu.memory_space<vmem>>, vector<8x96xf32>
    %cst_177 = arith.constant dense<0.000000e+00> : vector<8x96xf32>
    %467 = tpu.matmul %464, %291, %cst_177 {dimension_numbers = #tpu.dot_dimension_numbers<[1], [0], [0], [1], [0, 0, 1, 1], [], []>} : vector<8x32xf32>, vector<32x96xf32>, vector<8x96xf32> -> vector<8x96xf32>
    %468 = arith.addf %467, %294 : vector<8x96xf32>
    %469 = vector.extract_strided_slice %466 {offsets = [0, 0], sizes = [8, 32], strides = [1, 1]} : vector<8x96xf32> to vector<8x32xf32>
    %470 = vector.extract_strided_slice %468 {offsets = [0, 0], sizes = [8, 32], strides = [1, 1]} : vector<8x96xf32> to vector<8x32xf32>
    %471 = arith.addf %469, %470 : vector<8x32xf32>
    %cst_178 = arith.constant 5.000000e-01 : f32
    %472 = vector.broadcast %cst_178 : f32 to vector<8x32xf32>
    %473 = arith.mulf %472, %471 : vector<8x32xf32>
    %474 = math.tanh %473 : vector<8x32xf32>
    %cst_179 = arith.constant 1.000000e+00 : f32
    %475 = vector.broadcast %cst_179 : f32 to vector<8x32xf32>
    %476 = arith.addf %474, %475 : vector<8x32xf32>
    %cst_180 = arith.constant 5.000000e-01 : f32
    %477 = vector.broadcast %cst_180 : f32 to vector<8x32xf32>
    %478 = arith.mulf %477, %476 : vector<8x32xf32>
    %479 = vector.extract_strided_slice %466 {offsets = [0, 32], sizes = [8, 32], strides = [1, 1]} : vector<8x96xf32> to vector<8x32xf32>
    %480 = vector.extract_strided_slice %468 {offsets = [0, 32], sizes = [8, 32], strides = [1, 1]} : vector<8x96xf32> to vector<8x32xf32>
    %481 = arith.addf %479, %480 : vector<8x32xf32>
    %cst_181 = arith.constant 5.000000e-01 : f32
    %482 = vector.broadcast %cst_181 : f32 to vector<8x32xf32>
    %483 = arith.mulf %482, %481 : vector<8x32xf32>
    %484 = math.tanh %483 : vector<8x32xf32>
    %cst_182 = arith.constant 1.000000e+00 : f32
    %485 = vector.broadcast %cst_182 : f32 to vector<8x32xf32>
    %486 = arith.addf %484, %485 : vector<8x32xf32>
    %cst_183 = arith.constant 5.000000e-01 : f32
    %487 = vector.broadcast %cst_183 : f32 to vector<8x32xf32>
    %488 = arith.mulf %487, %486 : vector<8x32xf32>
    %489 = vector.extract_strided_slice %466 {offsets = [0, 64], sizes = [8, 32], strides = [1, 1]} : vector<8x96xf32> to vector<8x32xf32>
    %490 = vector.extract_strided_slice %468 {offsets = [0, 64], sizes = [8, 32], strides = [1, 1]} : vector<8x96xf32> to vector<8x32xf32>
    %491 = arith.mulf %478, %490 : vector<8x32xf32>
    %492 = arith.addf %489, %491 : vector<8x32xf32>
    %493 = math.tanh %492 : vector<8x32xf32>
    %cst_184 = arith.constant 1.000000e+00 : f32
    %494 = vector.broadcast %cst_184 : f32 to vector<8x32xf32>
    %495 = arith.subf %494, %488 : vector<8x32xf32>
    %496 = arith.mulf %495, %493 : vector<8x32xf32>
    %497 = arith.mulf %488, %464 : vector<8x32xf32>
    %498 = arith.addf %496, %497 : vector<8x32xf32>
    %c40_185 = arith.constant 40 : index
    %c0_186 = arith.constant 0 : index
    %499 = vector.load %arg13[%c40_185, %c0_186] : memref<64x32xf32, #tpu.memory_space<vmem>>, vector<8x32xf32>
    tpu.vector_store %arg13[%c40_185, %c0_186], %498 {strides = array<i32>} : memref<64x32xf32, #tpu.memory_space<vmem>>, vector<8x32xf32>,
    %c48_187 = arith.constant 48 : index
    %c0_188 = arith.constant 0 : index
    %500 = vector.load %arg12[%c48_187, %c0_188] : memref<64x96xf32, #tpu.memory_space<vmem>>, vector<8x96xf32>
    %cst_189 = arith.constant dense<0.000000e+00> : vector<8x96xf32>
    %501 = tpu.matmul %498, %291, %cst_189 {dimension_numbers = #tpu.dot_dimension_numbers<[1], [0], [0], [1], [0, 0, 1, 1], [], []>} : vector<8x32xf32>, vector<32x96xf32>, vector<8x96xf32> -> vector<8x96xf32>
    %502 = arith.addf %501, %294 : vector<8x96xf32>
    %503 = vector.extract_strided_slice %500 {offsets = [0, 0], sizes = [8, 32], strides = [1, 1]} : vector<8x96xf32> to vector<8x32xf32>
    %504 = vector.extract_strided_slice %502 {offsets = [0, 0], sizes = [8, 32], strides = [1, 1]} : vector<8x96xf32> to vector<8x32xf32>
    %505 = arith.addf %503, %504 : vector<8x32xf32>
    %cst_190 = arith.constant 5.000000e-01 : f32
    %506 = vector.broadcast %cst_190 : f32 to vector<8x32xf32>
    %507 = arith.mulf %506, %505 : vector<8x32xf32>
    %508 = math.tanh %507 : vector<8x32xf32>
    %cst_191 = arith.constant 1.000000e+00 : f32
    %509 = vector.broadcast %cst_191 : f32 to vector<8x32xf32>
    %510 = arith.addf %508, %509 : vector<8x32xf32>
    %cst_192 = arith.constant 5.000000e-01 : f32
    %511 = vector.broadcast %cst_192 : f32 to vector<8x32xf32>
    %512 = arith.mulf %511, %510 : vector<8x32xf32>
    %513 = vector.extract_strided_slice %500 {offsets = [0, 32], sizes = [8, 32], strides = [1, 1]} : vector<8x96xf32> to vector<8x32xf32>
    %514 = vector.extract_strided_slice %502 {offsets = [0, 32], sizes = [8, 32], strides = [1, 1]} : vector<8x96xf32> to vector<8x32xf32>
    %515 = arith.addf %513, %514 : vector<8x32xf32>
    %cst_193 = arith.constant 5.000000e-01 : f32
    %516 = vector.broadcast %cst_193 : f32 to vector<8x32xf32>
    %517 = arith.mulf %516, %515 : vector<8x32xf32>
    %518 = math.tanh %517 : vector<8x32xf32>
    %cst_194 = arith.constant 1.000000e+00 : f32
    %519 = vector.broadcast %cst_194 : f32 to vector<8x32xf32>
    %520 = arith.addf %518, %519 : vector<8x32xf32>
    %cst_195 = arith.constant 5.000000e-01 : f32
    %521 = vector.broadcast %cst_195 : f32 to vector<8x32xf32>
    %522 = arith.mulf %521, %520 : vector<8x32xf32>
    %523 = vector.extract_strided_slice %500 {offsets = [0, 64], sizes = [8, 32], strides = [1, 1]} : vector<8x96xf32> to vector<8x32xf32>
    %524 = vector.extract_strided_slice %502 {offsets = [0, 64], sizes = [8, 32], strides = [1, 1]} : vector<8x96xf32> to vector<8x32xf32>
    %525 = arith.mulf %512, %524 : vector<8x32xf32>
    %526 = arith.addf %523, %525 : vector<8x32xf32>
    %527 = math.tanh %526 : vector<8x32xf32>
    %cst_196 = arith.constant 1.000000e+00 : f32
    %528 = vector.broadcast %cst_196 : f32 to vector<8x32xf32>
    %529 = arith.subf %528, %522 : vector<8x32xf32>
    %530 = arith.mulf %529, %527 : vector<8x32xf32>
    %531 = arith.mulf %522, %498 : vector<8x32xf32>
    %532 = arith.addf %530, %531 : vector<8x32xf32>
    %c48_197 = arith.constant 48 : index
    %c0_198 = arith.constant 0 : index
    %533 = vector.load %arg13[%c48_197, %c0_198] : memref<64x32xf32, #tpu.memory_space<vmem>>, vector<8x32xf32>
    tpu.vector_store %arg13[%c48_197, %c0_198], %532 {strides = array<i32>} : memref<64x32xf32, #tpu.memory_space<vmem>>, vector<8x32xf32>,
    %c56_199 = arith.constant 56 : index
    %c0_200 = arith.constant 0 : index
    %534 = vector.load %arg12[%c56_199, %c0_200] : memref<64x96xf32, #tpu.memory_space<vmem>>, vector<8x96xf32>
    %cst_201 = arith.constant dense<0.000000e+00> : vector<8x96xf32>
    %535 = tpu.matmul %532, %291, %cst_201 {dimension_numbers = #tpu.dot_dimension_numbers<[1], [0], [0], [1], [0, 0, 1, 1], [], []>} : vector<8x32xf32>, vector<32x96xf32>, vector<8x96xf32> -> vector<8x96xf32>
    %536 = arith.addf %535, %294 : vector<8x96xf32>
    %537 = vector.extract_strided_slice %534 {offsets = [0, 0], sizes = [8, 32], strides = [1, 1]} : vector<8x96xf32> to vector<8x32xf32>
    %538 = vector.extract_strided_slice %536 {offsets = [0, 0], sizes = [8, 32], strides = [1, 1]} : vector<8x96xf32> to vector<8x32xf32>
    %539 = arith.addf %537, %538 : vector<8x32xf32>
    %cst_202 = arith.constant 5.000000e-01 : f32
    %540 = vector.broadcast %cst_202 : f32 to vector<8x32xf32>
    %541 = arith.mulf %540, %539 : vector<8x32xf32>
    %542 = math.tanh %541 : vector<8x32xf32>
    %cst_203 = arith.constant 1.000000e+00 : f32
    %543 = vector.broadcast %cst_203 : f32 to vector<8x32xf32>
    %544 = arith.addf %542, %543 : vector<8x32xf32>
    %cst_204 = arith.constant 5.000000e-01 : f32
    %545 = vector.broadcast %cst_204 : f32 to vector<8x32xf32>
    %546 = arith.mulf %545, %544 : vector<8x32xf32>
    %547 = vector.extract_strided_slice %534 {offsets = [0, 32], sizes = [8, 32], strides = [1, 1]} : vector<8x96xf32> to vector<8x32xf32>
    %548 = vector.extract_strided_slice %536 {offsets = [0, 32], sizes = [8, 32], strides = [1, 1]} : vector<8x96xf32> to vector<8x32xf32>
    %549 = arith.addf %547, %548 : vector<8x32xf32>
    %cst_205 = arith.constant 5.000000e-01 : f32
    %550 = vector.broadcast %cst_205 : f32 to vector<8x32xf32>
    %551 = arith.mulf %550, %549 : vector<8x32xf32>
    %552 = math.tanh %551 : vector<8x32xf32>
    %cst_206 = arith.constant 1.000000e+00 : f32
    %553 = vector.broadcast %cst_206 : f32 to vector<8x32xf32>
    %554 = arith.addf %552, %553 : vector<8x32xf32>
    %cst_207 = arith.constant 5.000000e-01 : f32
    %555 = vector.broadcast %cst_207 : f32 to vector<8x32xf32>
    %556 = arith.mulf %555, %554 : vector<8x32xf32>
    %557 = vector.extract_strided_slice %534 {offsets = [0, 64], sizes = [8, 32], strides = [1, 1]} : vector<8x96xf32> to vector<8x32xf32>
    %558 = vector.extract_strided_slice %536 {offsets = [0, 64], sizes = [8, 32], strides = [1, 1]} : vector<8x96xf32> to vector<8x32xf32>
    %559 = arith.mulf %546, %558 : vector<8x32xf32>
    %560 = arith.addf %557, %559 : vector<8x32xf32>
    %561 = math.tanh %560 : vector<8x32xf32>
    %cst_208 = arith.constant 1.000000e+00 : f32
    %562 = vector.broadcast %cst_208 : f32 to vector<8x32xf32>
    %563 = arith.subf %562, %556 : vector<8x32xf32>
    %564 = arith.mulf %563, %561 : vector<8x32xf32>
    %565 = arith.mulf %556, %532 : vector<8x32xf32>
    %566 = arith.addf %564, %565 : vector<8x32xf32>
    %c56_209 = arith.constant 56 : index
    %c0_210 = arith.constant 0 : index
    %567 = vector.load %arg13[%c56_209, %c0_210] : memref<64x32xf32, #tpu.memory_space<vmem>>, vector<8x32xf32>
    tpu.vector_store %arg13[%c56_209, %c0_210], %566 {strides = array<i32>} : memref<64x32xf32, #tpu.memory_space<vmem>>, vector<8x32xf32>,
    %c0_211 = arith.constant 0 : index
    %c0_212 = arith.constant 0 : index
    %568 = vector.load %arg13[%c0_211, %c0_212] : memref<64x32xf32, #tpu.memory_space<vmem>>, vector<64x32xf32>
    %c0_213 = arith.constant 0 : index
    %c0_214 = arith.constant 0 : index
    %569 = vector.load %arg9[%c0_213, %c0_214] : memref<32x16xf32, #tpu.memory_space<vmem>>, vector<32x16xf32>
    %cst_215 = arith.constant dense<0.000000e+00> : vector<64x16xf32>
    %570 = tpu.matmul %568, %569, %cst_215 {dimension_numbers = #tpu.dot_dimension_numbers<[1], [0], [0], [1], [0, 0, 1, 1], [], []>} : vector<64x32xf32>, vector<32x16xf32>, vector<64x16xf32> -> vector<64x16xf32>
    %c0_216 = arith.constant 0 : index
    %c0_217 = arith.constant 0 : index
    %571 = vector.load %arg10[%c0_216, %c0_217] : memref<1x16xf32, #tpu.memory_space<vmem>>, vector<1x16xf32>
    %572 = vector.broadcast %571 : vector<1x16xf32> to vector<64x16xf32>
    %573 = arith.addf %570, %572 : vector<64x16xf32>
    %c0_218 = arith.constant 0 : index
    %c0_219 = arith.constant 0 : index
    %574 = vector.load %arg11[%c0_218, %c0_219] : memref<64x16xf32, #tpu.memory_space<vmem>>, vector<64x16xf32>
    tpu.vector_store %arg11[%c0_218, %c0_219], %573 {strides = array<i32>} : memref<64x16xf32, #tpu.memory_space<vmem>>, vector<64x16xf32>,
    return
  }
}

</mosaic_0001>

<bundles_post_ra>
// kernel: gru_model_2_forward.1
= control target key start
LH: loop header
LB: loop body
LE: loop exit
PB: predicated region body
PF: predicated region fallthrough
CT: control target
= control target key end

     0   :  { %vm55_vm0 = vcmask 130048   ;;  %v2740_v10 = vmov 0.0|0.0   ;;  %vm2741_vm1 = vmmov 0   ;;  %v2742_v16 = vmov 0.0   ;;  %s2743_s23 = smov 64   ;;  %s3232_s1 = inlined_call_operand.vmem [shape: f32[16,96], index: 1, kind: input, shape index: {}]   ;;  %s3233_s0 = inlined_call_operand.vmem [shape: f32[64,16], index: 0, kind: input, shape index: {}]   ;;  %s3234_s2 = inlined_call_operand.vmem [shape: f32[32,96], index: 2, kind: input, shape index: {}]   ;;  %s3235_s3 = inlined_call_operand.vmem [shape: f32[1,96], index: 3, kind: input, shape index: {}]   ;;  %s3236_s4 = inlined_call_operand.vmem [shape: f32[1,96], index: 4, kind: input, shape index: {}]   ;;  %s3237_s5 = inlined_call_operand.vmem [shape: f32[32,96], index: 5, kind: input, shape index: {}]   ;;  %s3238_s7 = inlined_call_operand.vmem [shape: f32[1,96], index: 7, kind: input, shape index: {}]   ;;  %s3239_s6 = inlined_call_operand.vmem [shape: f32[32,96], index: 6, kind: input, shape index: {}]   ;;  %s3240_s8 = inlined_call_operand.vmem [shape: f32[1,96], index: 8, kind: input, shape index: {}]   ;;  %s3241_s9 = inlined_call_operand.vmem [shape: f32[32,16], index: 9, kind: input, shape index: {}]   ;;  %s3242_s10 = inlined_call_operand.vmem [shape: f32[1,16], index: 10, kind: input, shape index: {}]   ;;  %s3243_s11 = inlined_call_operand.vmem [shape: f32[64,16], index: 11, kind: output, shape index: {}]  }
   0x1   :  { %v46_v0 = vld [vmem:[%s3232_s1] sm:$0xff]  ;;  %v47_v1 = vld [vmem:[%s3232_s1 + $0x8] sm:$0xff]  ;;  %v44_v11 = vld [vmem:[%s3233_s0 + $0x30] sm:$0xff]  ;;  %vm185_vm2 = vcmask 785408   ;;  %vm206_vm3 = vcmask 261120  }
   0x2   :  { %v38_v2 = vld [vmem:[%s3233_s0] sm:$0xff]  ;;  %v2553_v3 = vpack.c.bf16 %v47_v1, %v46_v0  ;;  %v195_v6 = vld [vmem:[%s3234_s2 + $0x8] sm:$0xff]  ;;  %v196_v12 = vld [vmem:[%s3234_s2 + $0x10] sm:$0xff] }
   0x3   :  { %2325 = vmatprep.mubr.msk.f32.mxu0 %vm55_vm0, %v38_v2  ;;  %v42_v4 = vld [vmem:[%s3233_s0 + $0x20] sm:$0xff]  ;;  %v39_v7 = vld [vmem:[%s3233_s0 + $0x8] sm:$0xff]  ;;  %v197_v13 = vld [vmem:[%s3234_s2 + $0x18] sm:$0xff] }
   0x4   :  { %2331 = vmatprep.mubr.msk.f32.mxu1 %vm55_vm0, %v42_v4  ;;  %v194_v5 = vld [vmem:[%s3234_s2] sm:$0xff]  ;;  %2554 = vmatprep.subr.bf16.mxu0 %v2553_v3  ;;  %v43_v8 = vld [vmem:[%s3233_s0 + $0x28] sm:$0xff]  ;;  %v45_v14 = vld [vmem:[%s3233_s0 + $0x38] sm:$0xff]  ;;  %v2851_v15 = vpack.c.bf16 %v197_v13, %v196_v12 }
   0x5   :  { %2669 = vmatprep.subr.bf16.mxu1 %v2553_v3  ;;  %2556 = vmatpush3.bf16.msra.mxu0 %v2553_v3  ;;  %v2831_v9 = vpack.c.bf16 %v195_v6, %v194_v5  ;;  %v2873_v17 = vld [vmem:[%s3235_s3] ss:$0 sm:$0xff]  ;;  %v40_v0 = vld [vmem:[%s3233_s0 + $0x10] sm:$0xff]  ;;  %v41_v1 = vld [vmem:[%s3233_s0 + $0x18] sm:$0xff] }
   0x6   :  { %2670 = vmatpush3.bf16.msra.mxu1 %v2553_v3  ;;  %2569 = vmatprep.subr.bf16.mxu0 %v2740_v10  ;;  %v2888_v30 = vld [vmem:[%s3236_s4] ss:$0 sm:$0xff]  ;;  %s2744_s4 = smov 96  }
   0x7   :  { %2557 = vmatprep.subr.bf16.mxu1 %v2740_v10 }
   0x8   :  { %2326 = vmatmul.mubr.msk.f32.vlgmr.msra.gmra.mrb[0].mxu0 %vm55_vm0, %v39_v7 }
   0x9   :  { %2332 = vmatmul.mubr.msk.f32.vlgmr.msra.gmra.mrb[0].mxu1 %vm55_vm0, %v43_v8  ;;  %2571 = vmatpush3.bf16.msra.mxu0 %v2831_v9 }
   0xa   :  { %2559 = vmatpush3.bf16.msra.mxu1 %v2831_v9  ;;  %2334 = vmatprep.mubr.msk.f32.mxu1 %vm55_vm0, %v44_v11 }
   0xb   :  { %2560 = vmatprep.subr.bf16.mxu1 %v2740_v10  ;;  %2572 = vmatprep.subr.bf16.mxu0 %v2740_v10 }
   0xc   :  { %2328 = vmatprep.mubr.msk.f32.mxu0 %vm55_vm0, %v40_v0 }
   0xd   :  { %2335 = vmatmul.mubr.msk.f32.gmra.mrb[2].mxu1 %vm55_vm0, %v45_v14  ;;  %2574 = vmatpush3.bf16.msra.mxu0 %v2851_v15 }
   0xe   :  { %2562 = vmatpush3.bf16.msra.mxu1 %v2851_v15  ;;  %2345 = vmatprep.mubr.msk.f32.mxu1 %vm2741_vm1, %v2742_v16 }
   0xf   :  { %2563 = vmatprep.subr.bf16.mxu1 %v2740_v10  ;;  %2581 = vmatprep.subr.bf16.mxu0 %v2740_v10 }
  0x10   :  { %2329 = vmatmul.mubr.msk.f32.gmra.mrb[2].mxu0 %vm55_vm0, %v41_v1 }
  0x11   :  { %2346 = vmatmul.mubr.f32.vlgmr.msra.gmra.mrb[4].mxu1 %v2742_v16  ;;  %2367 = vmatprep.mubr.msk.f32.mxu0 %vm2741_vm1, %v2742_v16 }
  0x12   :  { %2565 = vmatpush3.bf16.msra.mxu1 %v2831_v9  ;;  %2356 = vmatprep.mubr.msk.f32.mxu1 %vm2741_vm1, %v2742_v16 }
  0x13   :  { %2566 = vmatprep.subr.bf16.mxu1 %v2740_v10 }
  0x16   :  { %2568 = vmatpush3.bf16.msra.mxu1 %v2851_v15 }
  0x17   :  { %2575 = vmatprep.subr.bf16.mxu1 %v2740_v10 }
  0xdb   :  { %v2327_v18 = vpop.f32.mrb[0].mxu0 }
  0xdc   :  { %v2333_v19 = vpop.f32.mrb[0].mxu1  ;;  %v152_v20 = vadd.f32 %v2327_v18, %v2873_v17  ;;  %v146_v22 = vpop.f32.mrb[1].mxu0 }
  0xdd   :  { %v172_v21 = vadd.f32 %v2333_v19, %v2873_v17  ;;  %v166_v23 = vpop.f32.mrb[1].mxu1  ;;  %v147_v24 = vadd.f32 %v2873_v17, %v146_v22 }
  0xde   :  { %v167_v25 = vadd.f32 %v2873_v17, %v166_v23  ;;  %187 = vst.msk [vmem:[#allocation2 + $0x8] sm:$0xff] %vm185_vm2, %v152_v20 }
  0xdf   :  { %191 = vst.msk [vmem:[#allocation2 + $0x28] sm:$0xff] %vm185_vm2, %v172_v21  ;;  %186 = vst.msk [vmem:[#allocation2] sm:$0xff] %vm185_vm2, %v147_v24 }
  0xe0   :  { %190 = vst.msk [vmem:[#allocation2 + $0x20] sm:$0xff] %vm185_vm2, %v167_v25  ;;  %v2336_v26 = vpop.f32.mrb[2].mxu1 }
  0xe1   :  { %v182_v27 = vadd.f32 %v2336_v26, %v2873_v17  ;;  %v176_v28 = vpop.f32.mrb[3].mxu1 }
  0xe2   :  { %v177_v29 = vadd.f32 %v2873_v17, %v176_v28 }
  0xe3   :  { %193 = vst.msk [vmem:[#allocation2 + $0x38] sm:$0xff] %vm185_vm2, %v182_v27  ;;  %v2330_v8 = vpop.f32.mrb[2].mxu0 }
  0xe4   :  { %192 = vst.msk [vmem:[#allocation2 + $0x30] sm:$0xff] %vm185_vm2, %v177_v29  ;;  %v276_v31 = vpop.f32.mrb[4].mxu1  ;;  %v162_v11 = vadd.f32 %v2330_v8, %v2873_v17  ;;  %v156_v12 = vpop.f32.mrb[3].mxu0 }
  0xe5   :  { %v277_v32 = vadd.f32 %v2888_v30, %v276_v31  ;;  %v2347_v33 = vpop.f32.mrb[5].mxu1  ;;  %v309_v54 = vld [vmem:[#allocation2 + $0x8] sm:$0xff]  ;;  %v157_v13 = vadd.f32 %v2873_v17, %v156_v12 }
  0xe6   :  { %v205_v34 = vld [vmem:[#allocation2] sm:$0xff]  ;;  %189 = vst.msk [vmem:[#allocation2 + $0x18] sm:$0xff] %vm185_vm2, %v162_v11 }
  0xe7   :  { %286 = vrot.lane.b32.xlu0 %v277_v32, %s2743_s23  ;;  %v280_v35 = vadd.f32 %v277_v32, %v205_v34  ;;  %188 = vst.msk [vmem:[#allocation2 + $0x10] sm:$0xff] %vm185_vm2, %v157_v13 }
  0xe9   :  { %v281_v36 = vmul.f32 0.5, %v280_v35 }
  0xeb   :  { %2676 = vtanh.f32 %v281_v36 }
  0xee   :  { %v411_v20 = vld [vmem:[#allocation2 + $0x10] sm:$0xff] }
  0xf5   :  { %v2677_v37 = vpop.eup %2676 }
  0xf6   :  { %v283_v38 = vadd.f32 1.0, %v2677_v37 }
  0xf8   :  { %v284_v39 = vmul.f32 0.5, %v283_v38 }
  0xfa   :  { %v296_v45 = vsub.f32 1.0, %v284_v39  ;;  %v302_v47 = vmul.f32 0.0, %v284_v39 }
 0x159   :  { %v287_v40 = vpop.permute.xlu0 %286 }
 0x15a   :  { %v289_v41 = vmul.f32 %v287_v40, %v284_v39 }
 0x15c   :  { %291 = vrot.lane.b32.xlu0 %v289_v41, %s2743_s23  ;;  %v513_v41 = vld [vmem:[#allocation2 + $0x18] sm:$0xff] }
 0x1ce   :  { %v292_v42 = vpop.permute.xlu0 %291 }
 0x1cf   :  { %v294_v43 = vadd.f32 %v292_v42, %v205_v34 }
 0x1d1   :  { %2678 = vtanh.f32 %v294_v43 }
 0x1db   :  { %v2679_v44 = vpop.eup %2678 }
 0x1dc   :  { %298 = vrot.lane.b32.xlu1 %v2679_v44, %s2744_s4 }
 0x24e   :  { %v299_v46 = vpop.permute.xlu1 %298 }
 0x24f   :  { %v301_v48 = vmul.f32 %v299_v46, %v296_v45 }
 0x251   :  { %v303_v49 = vadd.f32 %v302_v47, %v301_v48 }
 0x253   :  { %305 = vrot.lane.b32.xlu1 %v303_v49, %s2744_s4 }
 0x2c5   :  { %v306_v50 = vpop.permute.xlu1 %305 }
 0x2c6   :  { %308 = vst.msk [vmem:[#allocation3] sm:$0xff] %vm206_vm3, %v306_v50  ;;  %2357 = vmatmul.mubr.msk.f32.vlgmr.msra.gmra.mrb[6].mxu1 %vm206_vm3, %v306_v50 }
 0x2c7   :  { %2577 = vmatpush3.bf16.msra.mxu1 %v2831_v9  ;;  %2378 = vmatprep.mubr.msk.f32.mxu1 %vm2741_vm1, %v2742_v16 }
 0x2c8   :  { %2578 = vmatprep.subr.bf16.mxu1 %v2740_v10 }
 0x2cb   :  { %2580 = vmatpush3.bf16.msra.mxu1 %v2851_v15 }
 0x2cc   :  { %2587 = vmatprep.subr.bf16.mxu1 %v2740_v10 }
 0x399   :  { %v378_v51 = vpop.f32.mrb[6].mxu1 }
 0x39a   :  { %v379_v52 = vadd.f32 %v2888_v30, %v378_v51  ;;  %v2358_v53 = vpop.f32.mrb[7].mxu1 }
 0x39c   :  { %388 = vrot.lane.b32.xlu0 %v379_v52, %s2743_s23  ;;  %v382_v55 = vadd.f32 %v379_v52, %v309_v54 }
 0x39e   :  { %v383_v56 = vmul.f32 0.5, %v382_v55 }
 0x3a0   :  { %2680 = vtanh.f32 %v383_v56 }
 0x3aa   :  { %v2681_v57 = vpop.eup %2680 }
 0x3ab   :  { %v385_v58 = vadd.f32 1.0, %v2681_v57 }
 0x3ad   :  { %v386_v59 = vmul.f32 0.5, %v385_v58 }
 0x3af   :  { %v398_v3 = vsub.f32 1.0, %v386_v59  ;;  %v404_v5 = vmul.f32 %v386_v59, %v303_v49 }
 0x40e   :  { %v389_v60 = vpop.permute.xlu0 %388 }
 0x40f   :  { %v391_v61 = vmul.f32 %v389_v60, %v386_v59 }
 0x411   :  { %393 = vrot.lane.b32.xlu1 %v391_v61, %s2743_s23  ;;  %v615_v61 = vld [vmem:[#allocation2 + $0x20] sm:$0xff] }
 0x483   :  { %v394_v62 = vpop.permute.xlu1 %393 }
 0x484   :  { %v396_v63 = vadd.f32 %v394_v62, %v309_v54 }
 0x486   :  { %2682 = vtanh.f32 %v396_v63 }
 0x490   :  { %v2683_v2 = vpop.eup %2682 }
 0x491   :  { %400 = vrot.lane.b32.xlu0 %v2683_v2, %s2744_s4 }
 0x503   :  { %v401_v4 = vpop.permute.xlu0 %400 }
 0x504   :  { %v403_v6 = vmul.f32 %v401_v4, %v398_v3 }
 0x506   :  { %v405_v7 = vadd.f32 %v404_v5, %v403_v6 }
 0x508   :  { %407 = vrot.lane.b32.xlu1 %v405_v7, %s2744_s4 }
 0x57a   :  { %v408_v14 = vpop.permute.xlu1 %407 }
 0x57b   :  { %410 = vst.msk [vmem:[#allocation3 + $0x8] sm:$0xff] %vm206_vm3, %v408_v14  ;;  %2368 = vmatmul.mubr.msk.f32.vlgmr.msra.gmra.mrb[4].mxu0 %vm206_vm3, %v408_v14 }
 0x57c   :  { %2583 = vmatpush3.bf16.msra.mxu0 %v2831_v9  ;;  %2389 = vmatprep.mubr.msk.f32.mxu0 %vm2741_vm1, %v2742_v16 }
 0x57d   :  { %2584 = vmatprep.subr.bf16.mxu0 %v2740_v10 }
 0x580   :  { %2586 = vmatpush3.bf16.msra.mxu0 %v2851_v15 }
 0x581   :  { %2593 = vmatprep.subr.bf16.mxu0 %v2740_v10 }
 0x64e   :  { %v480_v17 = vpop.f32.mrb[4].mxu0 }
 0x64f   :  { %v481_v18 = vadd.f32 %v2888_v30, %v480_v17  ;;  %v2369_v19 = vpop.f32.mrb[5].mxu0 }
 0x651   :  { %490 = vrot.lane.b32.xlu0 %v481_v18, %s2743_s23  ;;  %v484_v21 = vadd.f32 %v481_v18, %v411_v20 }
 0x653   :  { %v485_v22 = vmul.f32 0.5, %v484_v21  ;;  %v717_v21 = vld [vmem:[#allocation2 + $0x28] sm:$0xff] }
 0x655   :  { %2684 = vtanh.f32 %v485_v22 }
 0x65f   :  { %v2685_v23 = vpop.eup %2684 }
 0x660   :  { %v487_v24 = vadd.f32 1.0, %v2685_v23 }
 0x662   :  { %v488_v25 = vmul.f32 0.5, %v487_v24 }
 0x664   :  { %v500_v32 = vsub.f32 1.0, %v488_v25  ;;  %v506_v34 = vmul.f32 %v488_v25, %v405_v7 }
 0x6c3   :  { %v491_v26 = vpop.permute.xlu0 %490 }
 0x6c4   :  { %v493_v27 = vmul.f32 %v491_v26, %v488_v25 }
 0x6c6   :  { %495 = vrot.lane.b32.xlu1 %v493_v27, %s2743_s23 }
 0x738   :  { %v496_v28 = vpop.permute.xlu1 %495 }
 0x739   :  { %v498_v29 = vadd.f32 %v496_v28, %v411_v20 }
 0x73b   :  { %2686 = vtanh.f32 %v498_v29  ;;  %v1031_v29 = vld [vmem:[%s3237_s5] sm:$0xff] }
 0x745   :  { %v2687_v31 = vpop.eup %2686 }
 0x746   :  { %502 = vrot.lane.b32.xlu0 %v2687_v31, %s2744_s4  ;;  %v1032_v31 = vld [vmem:[%s3237_s5 + $0x8] sm:$0xff] }
 0x7b8   :  { %v503_v33 = vpop.permute.xlu0 %502 }
 0x7b9   :  { %v505_v35 = vmul.f32 %v503_v33, %v500_v32  ;;  %v2605_v32 = vpack.c.bf16 %v1032_v31, %v1031_v29  ;;  %v3064_v29 = vld [vmem:[%s3240_s8] ss:$0 sm:$0xff] }
 0x7bb   :  { %v507_v36 = vadd.f32 %v506_v34, %v505_v35 }
 0x7bd   :  { %509 = vrot.lane.b32.xlu1 %v507_v36, %s2744_s4 }
 0x82f   :  { %v510_v37 = vpop.permute.xlu1 %509 }
 0x830   :  { %512 = vst.msk [vmem:[#allocation3 + $0x10] sm:$0xff] %vm206_vm3, %v510_v37  ;;  %2379 = vmatmul.mubr.msk.f32.vlgmr.msra.gmra.mrb[8].mxu1 %vm206_vm3, %v510_v37 }
 0x831   :  { %2589 = vmatpush3.bf16.msra.mxu1 %v2831_v9  ;;  %2400 = vmatprep.mubr.msk.f32.mxu1 %vm2741_vm1, %v2742_v16 }
 0x832   :  { %2590 = vmatprep.subr.bf16.mxu1 %v2740_v10 }
 0x835   :  { %2592 = vmatpush3.bf16.msra.mxu1 %v2851_v15 }
 0x836   :  { %2599 = vmatprep.subr.bf16.mxu1 %v2740_v10 }
 0x903   :  { %v582_v38 = vpop.f32.mrb[8].mxu1 }
 0x904   :  { %v583_v39 = vadd.f32 %v2888_v30, %v582_v38  ;;  %v2380_v40 = vpop.f32.mrb[9].mxu1 }
 0x905   :  { %v1034_v40 = vld [vmem:[%s3237_s5 + $0x18] sm:$0xff] }
 0x906   :  { %592 = vrot.lane.b32.xlu0 %v583_v39, %s2743_s23  ;;  %v586_v42 = vadd.f32 %v583_v39, %v513_v41  ;;  %v1033_v39 = vld [vmem:[%s3237_s5 + $0x10] sm:$0xff] }
 0x908   :  { %v587_v43 = vmul.f32 0.5, %v586_v42 }
 0x90a   :  { %2688 = vtanh.f32 %v587_v43  ;;  %v1023_v43 = vld [vmem:[#allocation3] sm:$0xff] }
 0x914   :  { %v2689_v44 = vpop.eup %2688 }
 0x915   :  { %v589_v45 = vadd.f32 1.0, %v2689_v44  ;;  %v1024_v44 = vld [vmem:[#allocation3 + $0x8] sm:$0xff] }
 0x917   :  { %v590_v46 = vmul.f32 0.5, %v589_v45  ;;  %v1025_v45 = vld [vmem:[#allocation3 + $0x10] sm:$0xff] }
 0x919   :  { %v602_v52 = vsub.f32 1.0, %v590_v46  ;;  %v608_v54 = vmul.f32 %v590_v46, %v507_v36 }
 0x978   :  { %v593_v47 = vpop.permute.xlu0 %592 }
 0x979   :  { %v595_v48 = vmul.f32 %v593_v47, %v590_v46 }
 0x97b   :  { %597 = vrot.lane.b32.xlu1 %v595_v48, %s2743_s23 }
 0x9ed   :  { %v598_v49 = vpop.permute.xlu1 %597 }
 0x9ee   :  { %v600_v50 = vadd.f32 %v598_v49, %v513_v41  ;;  %v2609_v41 = vpack.c.bf16 %v1034_v40, %v1033_v39 }
 0x9f0   :  { %2690 = vtanh.f32 %v600_v50 }
 0x9fa   :  { %v2691_v51 = vpop.eup %2690 }
 0x9fb   :  { %604 = vrot.lane.b32.xlu0 %v2691_v51, %s2744_s4 }
 0xa6d   :  { %v605_v53 = vpop.permute.xlu0 %604 }
 0xa6e   :  { %v607_v55 = vmul.f32 %v605_v53, %v602_v52  ;;  %v3004_v52 = vld [vmem:[%s3238_s7] ss:$0 sm:$0xff] }
 0xa70   :  { %v609_v56 = vadd.f32 %v608_v54, %v607_v55 }
 0xa72   :  { %611 = vrot.lane.b32.xlu1 %v609_v56, %s2744_s4 }
 0xae4   :  { %v612_v57 = vpop.permute.xlu1 %611 }
 0xae5   :  { %614 = vst.msk [vmem:[#allocation3 + $0x18] sm:$0xff] %vm206_vm3, %v612_v57  ;;  %2390 = vmatmul.mubr.msk.f32.vlgmr.msra.gmra.mrb[6].mxu0 %vm206_vm3, %v612_v57 }
 0xae6   :  { %2595 = vmatpush3.bf16.msra.mxu0 %v2831_v9  ;;  %2411 = vmatprep.mubr.msk.f32.mxu0 %vm2741_vm1, %v2742_v16 }
 0xae7   :  { %2596 = vmatprep.subr.bf16.mxu0 %v2740_v10 }
 0xaea   :  { %2598 = vmatpush3.bf16.msra.mxu0 %v2851_v15 }
 0xaeb   :  { %2606 = vmatprep.subr.bf16.mxu0 %v2605_v32 }
 0xaec   :  { %v1026_v46 = vld [vmem:[#allocation3 + $0x18] sm:$0xff] }
 0xbb8   :  { %v684_v58 = vpop.f32.mrb[6].mxu0 }
 0xbb9   :  { %v685_v59 = vadd.f32 %v2888_v30, %v684_v58  ;;  %v2391_v60 = vpop.f32.mrb[7].mxu0 }
 0xbbb   :  { %694 = vrot.lane.b32.xlu0 %v685_v59, %s2743_s23  ;;  %v688_v62 = vadd.f32 %v685_v59, %v615_v61 }
 0xbbd   :  { %v689_v63 = vmul.f32 0.5, %v688_v62 }
 0xbbf   :  { %2692 = vtanh.f32 %v689_v63 }
 0xbc9   :  { %v2693_v0 = vpop.eup %2692 }
 0xbca   :  { %v691_v1 = vadd.f32 1.0, %v2693_v0 }
 0xbcc   :  { %v692_v2 = vmul.f32 0.5, %v691_v1  ;;  %v819_v1 = vld [vmem:[#allocation2 + $0x30] sm:$0xff] }
 0xbce   :  { %v704_v8 = vsub.f32 1.0, %v692_v2  ;;  %v710_v12 = vmul.f32 %v692_v2, %v609_v56 }
 0xc2d   :  { %v695_v3 = vpop.permute.xlu0 %694 }
 0xc2e   :  { %v697_v4 = vmul.f32 %v695_v3, %v692_v2 }
 0xc30   :  { %699 = vrot.lane.b32.xlu1 %v697_v4, %s2743_s23 }
 0xca2   :  { %v700_v5 = vpop.permute.xlu1 %699 }
 0xca3   :  { %v702_v6 = vadd.f32 %v700_v5, %v615_v61 }
 0xca5   :  { %2694 = vtanh.f32 %v702_v6 }
 0xcaf   :  { %v2695_v7 = vpop.eup %2694 }
 0xcb0   :  { %706 = vrot.lane.b32.xlu0 %v2695_v7, %s2744_s4 }
 0xd22   :  { %v707_v11 = vpop.permute.xlu0 %706 }
 0xd23   :  { %v709_v13 = vmul.f32 %v707_v11, %v704_v8 }
 0xd25   :  { %v711_v14 = vadd.f32 %v710_v12, %v709_v13 }
 0xd27   :  { %713 = vrot.lane.b32.xlu1 %v711_v14, %s2744_s4 }
 0xd99   :  { %v714_v17 = vpop.permute.xlu1 %713 }
 0xd9a   :  { %716 = vst.msk [vmem:[#allocation3 + $0x20] sm:$0xff] %vm206_vm3, %v714_v17  ;;  %2401 = vmatmul.mubr.msk.f32.vlgmr.msra.gmra.mrb[10].mxu1 %vm206_vm3, %v714_v17  ;;  %v1180_v17 = vld [vmem:[%s3239_s6 + $0x8] sm:$0xff] }
 0xd9b   :  { %2601 = vmatpush3.bf16.msra.mxu1 %v2831_v9  ;;  %2422 = vmatprep.mubr.msk.f32.mxu1 %vm2741_vm1, %v2742_v16 }
 0xd9c   :  { %2602 = vmatprep.subr.bf16.mxu1 %v2740_v10 }
 0xd9f   :  { %2604 = vmatpush3.bf16.msra.mxu1 %v2851_v15 }
 0xda0   :  { %2613 = vmatprep.subr.bf16.mxu1 %v2740_v10 }
 0xda1   :  { %v1027_v47 = vld [vmem:[#allocation3 + $0x20] sm:$0xff] }
 0xe6d   :  { %v786_v18 = vpop.f32.mrb[10].mxu1 }
 0xe6e   :  { %v787_v19 = vadd.f32 %v2888_v30, %v786_v18  ;;  %v2402_v20 = vpop.f32.mrb[11].mxu1 }
 0xe6f   :  { %v1182_v20 = vld [vmem:[%s3239_s6 + $0x18] sm:$0xff] }
 0xe70   :  { %796 = vrot.lane.b32.xlu0 %v787_v19, %s2743_s23  ;;  %v790_v22 = vadd.f32 %v787_v19, %v717_v21  ;;  %v1181_v19 = vld [vmem:[%s3239_s6 + $0x10] sm:$0xff] }
 0xe72   :  { %v791_v23 = vmul.f32 0.5, %v790_v22 }
 0xe74   :  { %2696 = vtanh.f32 %v791_v23 }
 0xe7e   :  { %v2697_v9 = vpop.eup %2696 }
 0xe7f   :  { %v793_v24 = vadd.f32 1.0, %v2697_v9 }
 0xe81   :  { %v794_v25 = vmul.f32 0.5, %v793_v24 }
 0xe83   :  { %v806_v34 = vsub.f32 1.0, %v794_v25  ;;  %v812_v36 = vmul.f32 %v794_v25, %v711_v14  ;;  %v1179_v14 = vld [vmem:[%s3239_s6] sm:$0xff] }
 0xe84   :  { %v3026_v18 = vpack.c.bf16 %v1180_v17, %v1179_v14 }
 0xee2   :  { %v797_v26 = vpop.permute.xlu0 %796 }
 0xee3   :  { %v799_v27 = vmul.f32 %v797_v26, %v794_v25 }
 0xee5   :  { %801 = vrot.lane.b32.xlu1 %v799_v27, %s2743_s23 }
 0xf57   :  { %v802_v15 = vpop.permute.xlu1 %801 }
 0xf58   :  { %v804_v28 = vadd.f32 %v802_v15, %v717_v21  ;;  %v3036_v21 = vpack.c.bf16 %v1182_v20, %v1181_v19 }
 0xf5a   :  { %2698 = vtanh.f32 %v804_v28 }
 0xf64   :  { %v2699_v33 = vpop.eup %2698 }
 0xf65   :  { %808 = vrot.lane.b32.xlu0 %v2699_v33, %s2744_s4 }
 0xfd7   :  { %v809_v35 = vpop.permute.xlu0 %808 }
 0xfd8   :  { %v811_v37 = vmul.f32 %v809_v35, %v806_v34 }
 0xfda   :  { %v2980_v38 = vadd.f32 %v812_v36, %v811_v37 }
 0xfdc   :  { %815 = vrot.lane.b32.xlu1 %v2980_v38, %s2744_s4 }
0x104e   :  { %v816_v42 = vpop.permute.xlu1 %815 }
0x104f   :  { %818 = vst.msk [vmem:[#allocation3 + $0x28] sm:$0xff] %vm206_vm3, %v816_v42  ;;  %2412 = vmatmul.mubr.msk.f32.vlgmr.msra.gmra.mrb[8].mxu0 %vm206_vm3, %v816_v42 }
0x1050   :  { %2608 = vmatpush3.bf16.msra.mxu0 %v2605_v32  ;;  %2433 = vmatprep.mubr.msk.f32.mxu0 %vm206_vm3, %v1023_v43 }
0x1051   :  { %2610 = vmatprep.subr.bf16.mxu0 %v2609_v41 }
0x1054   :  { %2612 = vmatpush3.bf16.msra.mxu0 %v2609_v41 }
0x1055   :  { %2625 = vmatprep.subr.bf16.mxu0 %v2740_v10 }
0x1056   :  { %v1028_v48 = vld [vmem:[#allocation3 + $0x28] sm:$0xff] }
0x1057   :  { %2434 = vmatmul.mubr.msk.f32.vlgmr.msra.gmra.mrb[10].mxu0 %vm206_vm3, %v1024_v44 }
0x1058   :  { %2436 = vmatprep.mubr.msk.f32.mxu0 %vm206_vm3, %v1025_v45  ;;  %2627 = vmatpush3.bf16.msra.mxu0 %v3026_v18 }
0x1059   :  { %2628 = vmatprep.subr.bf16.mxu0 %v2740_v10 }
0x105b   :  { %2437 = vmatmul.mubr.msk.f32.gmra.mrb[12].mxu0 %vm206_vm3, %v1026_v46  ;;  %v921_v46 = vld [vmem:[#allocation2 + $0x38] sm:$0xff] }
0x105c   :  { %2439 = vmatprep.mubr.msk.f32.mxu0 %vm206_vm3, %v1027_v47  ;;  %2630 = vmatpush3.bf16.msra.mxu0 %v3036_v21 }
0x105d   :  { %2637 = vmatprep.subr.bf16.mxu0 %v2740_v10 }
0x105f   :  { %2440 = vmatmul.mubr.msk.f32.gmra.mrb[14].mxu0 %vm206_vm3, %v1028_v48 }
0x1122   :  { %v888_v49 = vpop.f32.mrb[8].mxu0 }
0x1123   :  { %v889_v50 = vadd.f32 %v2888_v30, %v888_v49  ;;  %v2413_v51 = vpop.f32.mrb[9].mxu0 }
0x1125   :  { %898 = vrot.lane.b32.xlu0 %v889_v50, %s2743_s23  ;;  %v892_v2 = vadd.f32 %v889_v50, %v819_v1 }
0x1127   :  { %v893_v3 = vmul.f32 0.5, %v892_v2 }
0x1129   :  { %2700 = vtanh.f32 %v893_v3 }
0x112a   :  { %v2435_v53 = vpop.f32.mrb[10].mxu0 }
0x112b   :  { %v1138_v54 = vadd.f32 %v2435_v53, %v3004_v52  ;;  %v1132_v55 = vpop.f32.mrb[11].mxu0 }
0x112c   :  { %v1133_v56 = vadd.f32 %v3004_v52, %v1132_v55 }
0x112d   :  { %1172 = vst.msk [vmem:[#allocation2 + $0x8] sm:$0xff] %vm185_vm2, %v1138_v54 }
0x112e   :  { %1171 = vst.msk [vmem:[#allocation2] sm:$0xff] %vm185_vm2, %v1133_v56  ;;  %v2438_v57 = vpop.f32.mrb[12].mxu0 }
0x112f   :  { %v1148_v58 = vadd.f32 %v2438_v57, %v3004_v52  ;;  %v1142_v59 = vpop.f32.mrb[13].mxu0 }
0x1130   :  { %v1143_v60 = vadd.f32 %v3004_v52, %v1142_v59 }
0x1131   :  { %1174 = vst.msk [vmem:[#allocation2 + $0x18] sm:$0xff] %vm185_vm2, %v1148_v58 }
0x1132   :  { %1173 = vst.msk [vmem:[#allocation2 + $0x10] sm:$0xff] %vm185_vm2, %v1143_v60  ;;  %v2441_v61 = vpop.f32.mrb[14].mxu0 }
0x1133   :  { %v1158_v62 = vadd.f32 %v2441_v61, %v3004_v52  ;;  %v1152_v63 = vpop.f32.mrb[15].mxu0  ;;  %v2701_v4 = vpop.eup %2700 }
0x1134   :  { %v1153_v0 = vadd.f32 %v3004_v52, %v1152_v63  ;;  %v895_v5 = vadd.f32 1.0, %v2701_v4 }
0x1135   :  { %1176 = vst.msk [vmem:[#allocation2 + $0x28] sm:$0xff] %vm185_vm2, %v1158_v62  ;;  %v1190_v34 = vld [vmem:[#allocation2] sm:$0xff] }
0x1136   :  { %1175 = vst.msk [vmem:[#allocation2 + $0x20] sm:$0xff] %vm185_vm2, %v1153_v0  ;;  %v896_v6 = vmul.f32 0.5, %v895_v5 }
0x1138   :  { %v908_v22 = vsub.f32 1.0, %v896_v6  ;;  %v914_v9 = vmul.f32 %v896_v6, %v2980_v38 }
0x1197   :  { %v899_v7 = vpop.permute.xlu0 %898 }
0x1198   :  { %v901_v8 = vmul.f32 %v899_v7, %v896_v6 }
0x119a   :  { %903 = vrot.lane.b32.xlu1 %v901_v8, %s2743_s23 }
0x120c   :  { %v904_v11 = vpop.permute.xlu1 %903 }
0x120d   :  { %v906_v12 = vadd.f32 %v904_v11, %v819_v1  ;;  %v1290_v11 = vld [vmem:[#allocation2 + $0x8] sm:$0xff] }
0x120f   :  { %2702 = vtanh.f32 %v906_v12 }
0x1219   :  { %v2703_v13 = vpop.eup %2702 }
0x121a   :  { %910 = vrot.lane.b32.xlu0 %v2703_v13, %s2744_s4 }
0x128c   :  { %v911_v23 = vpop.permute.xlu0 %910 }
0x128d   :  { %v913_v24 = vmul.f32 %v911_v23, %v908_v22 }
0x128f   :  { %v3041_v25 = vadd.f32 %v914_v9, %v913_v24 }
0x1291   :  { %917 = vrot.lane.b32.xlu1 %v3041_v25, %s2744_s4 }
0x1303   :  { %v918_v26 = vpop.permute.xlu1 %917 }
0x1304   :  { %920 = vst.msk [vmem:[#allocation3 + $0x30] sm:$0xff] %vm206_vm3, %v918_v26  ;;  %2423 = vmatmul.mubr.msk.f32.vlgmr.msra.gmra.mrb[12].mxu1 %vm206_vm3, %v918_v26 }
0x1305   :  { %2615 = vmatpush3.bf16.msra.mxu1 %v3026_v18  ;;  %2453 = vmatprep.mubr.msk.f32.mxu1 %vm2741_vm1, %v2742_v16 }
0x1306   :  { %2616 = vmatprep.subr.bf16.mxu1 %v2740_v10 }
0x1309   :  { %2618 = vmatpush3.bf16.msra.mxu1 %v3036_v21 }
0x130a   :  { %2619 = vmatprep.subr.bf16.mxu1 %v2740_v10 }
0x130b   :  { %v1029_v27 = vld [vmem:[#allocation3 + $0x30] sm:$0xff] }
0x130c   :  { %2454 = vmatmul.mubr.f32.vlgmr.msra.gmra.mrb[14].mxu1 %v2742_v16  ;;  %2442 = vmatprep.mubr.msk.f32.mxu0 %vm206_vm3, %v1029_v27 }
0x130d   :  { %2621 = vmatpush3.bf16.msra.mxu1 %v3026_v18  ;;  %2464 = vmatprep.mubr.msk.f32.mxu1 %vm2741_vm1, %v2742_v16 }
0x130e   :  { %2622 = vmatprep.subr.bf16.mxu1 %v2740_v10 }
0x1311   :  { %2624 = vmatpush3.bf16.msra.mxu1 %v3036_v21 }
0x1312   :  { %2631 = vmatprep.subr.bf16.mxu1 %v2740_v10 }
0x13d7   :  { %v990_v15 = vpop.f32.mrb[12].mxu1 }
0x13d8   :  { %v2424_v28 = vpop.f32.mrb[13].mxu1  ;;  %v991_v45 = vadd.f32 %v2888_v30, %v990_v15 }
0x13da   :  { %v994_v47 = vadd.f32 %v991_v45, %v921_v46 }
0x13dc   :  { %v995_v48 = vmul.f32 0.5, %v994_v47 }
0x13df   :  { %v1257_v31 = vpop.f32.mrb[14].mxu1 }
0x13e0   :  { %v1258_v32 = vadd.f32 %v3064_v29, %v1257_v31  ;;  %v2455_v33 = vpop.f32.mrb[15].mxu1 }
0x13e2   :  { %1267 = vrot.lane.b32.xlu0 %v1258_v32, %s2743_s23  ;;  %v1261_v35 = vadd.f32 %v1258_v32, %v1190_v34 }
0x13e4   :  { %v1262_v36 = vmul.f32 0.5, %v1261_v35 }
0x13e6   :  { %2704 = vtanh.f32 %v1262_v36 }
0x13f0   :  { %v2705_v37 = vpop.eup %2704 }
0x13f1   :  { %v1264_v38 = vadd.f32 1.0, %v2705_v37 }
0x13f3   :  { %v1265_v39 = vmul.f32 0.5, %v1264_v38  ;;  %v1392_v38 = vld [vmem:[#allocation2 + $0x10] sm:$0xff] }
0x13f5   :  { %v1277_v50 = vsub.f32 1.0, %v1265_v39  ;;  %v1283_v54 = vmul.f32 0.0, %v1265_v39 }
0x1454   :  { %v1268_v40 = vpop.permute.xlu0 %1267 }
0x1455   :  { %v1270_v41 = vmul.f32 %v1268_v40, %v1265_v39 }
0x1457   :  { %1272 = vrot.lane.b32.xlu1 %v1270_v41, %s2743_s23 }
0x14c9   :  { %v1273_v42 = vpop.permute.xlu1 %1272 }
0x14ca   :  { %v1275_v43 = vadd.f32 %v1273_v42, %v1190_v34 }
0x14cc   :  { %2706 = vtanh.f32 %v1275_v43 }
0x14cd   :  { %2708 = vtanh.f32 %v995_v48 }
0x14d6   :  { %v2707_v44 = vpop.eup %2706 }
0x14d7   :  { %1279 = vrot.lane.b32.xlu0 %v2707_v44, %s2744_s4  ;;  %v2709_v49 = vpop.eup %2708 }
0x14d8   :  { %v997_v51 = vadd.f32 1.0, %v2709_v49 }
0x14da   :  { %v998_v57 = vmul.f32 0.5, %v997_v51 }
0x14db   :  { %1000 = vrot.lane.b32.xlu0 %v991_v45, %s2743_s23 }
0x14dc   :  { %v1010_v63 = vsub.f32 1.0, %v998_v57  ;;  %v1016_v1 = vmul.f32 %v998_v57, %v3041_v25 }
0x1549   :  { %v1280_v53 = vpop.permute.xlu0 %1279 }
0x154a   :  { %v1282_v55 = vmul.f32 %v1280_v53, %v1277_v50 }
0x154c   :  { %v1284_v56 = vadd.f32 %v1283_v54, %v1282_v55 }
0x154d   :  { %v1001_v58 = vpop.permute.xlu0 %1000 }
0x154e   :  { %v1003_v59 = vmul.f32 %v1001_v58, %v998_v57  ;;  %1286 = vrot.lane.b32.xlu1 %v1284_v56, %s2744_s4 }
0x1550   :  { %1005 = vrot.lane.b32.xlu0 %v1003_v59, %s2743_s23  ;;  %v1494_v59 = vld [vmem:[#allocation2 + $0x18] sm:$0xff] }
0x15c0   :  { %v1287_v30 = vpop.permute.xlu1 %1286 }
0x15c1   :  { %1289 = vst.msk [vmem:[#allocation3] sm:$0xff] %vm206_vm3, %v1287_v30  ;;  %2465 = vmatmul.mubr.msk.f32.vlgmr.msra.gmra.mrb[16].mxu1 %vm206_vm3, %v1287_v30 }
0x15c2   :  { %v1006_v60 = vpop.permute.xlu0 %1005  ;;  %2633 = vmatpush3.bf16.msra.mxu1 %v3026_v18  ;;  %2486 = vmatprep.mubr.msk.f32.mxu1 %vm2741_vm1, %v2742_v16 }
0x15c3   :  { %v1008_v61 = vadd.f32 %v1006_v60, %v921_v46  ;;  %2634 = vmatprep.subr.bf16.mxu1 %v2740_v10 }
0x15c5   :  { %2710 = vtanh.f32 %v1008_v61 }
0x15c6   :  { %2636 = vmatpush3.bf16.msra.mxu1 %v3036_v21 }
0x15c7   :  { %2643 = vmatprep.subr.bf16.mxu1 %v2740_v10 }
0x15cf   :  { %v2711_v62 = vpop.eup %2710 }
0x15d0   :  { %1012 = vrot.lane.b32.xlu0 %v2711_v62, %s2744_s4 }
0x1642   :  { %v1013_v0 = vpop.permute.xlu0 %1012 }
0x1643   :  { %v1015_v2 = vmul.f32 %v1013_v0, %v1010_v63 }
0x1645   :  { %v1017_v3 = vadd.f32 %v1016_v1, %v1015_v2 }
0x1647   :  { %1019 = vrot.lane.b32.xlu0 %v1017_v3, %s2744_s4 }
0x1694   :  { %v1359_v4 = vpop.f32.mrb[16].mxu1 }
0x1695   :  { %v1360_v5 = vadd.f32 %v3064_v29, %v1359_v4  ;;  %v2466_v6 = vpop.f32.mrb[17].mxu1 }
0x1697   :  { %1369 = vrot.lane.b32.xlu1 %v1360_v5, %s2743_s23  ;;  %v1363_v12 = vadd.f32 %v1360_v5, %v1290_v11 }
0x1699   :  { %v1364_v13 = vmul.f32 0.5, %v1363_v12 }
0x169b   :  { %2712 = vtanh.f32 %v1364_v13 }
0x16a5   :  { %v2713_v14 = vpop.eup %2712 }
0x16a6   :  { %v1366_v17 = vadd.f32 1.0, %v2713_v14 }
0x16a8   :  { %v1367_v19 = vmul.f32 0.5, %v1366_v17 }
0x16aa   :  { %v1379_v28 = vsub.f32 1.0, %v1367_v19  ;;  %v1385_v32 = vmul.f32 %v1367_v19, %v1284_v56 }
0x16b9   :  { %v1020_v7 = vpop.permute.xlu0 %1019 }
0x16ba   :  { %1022 = vst.msk [vmem:[#allocation3 + $0x38] sm:$0xff] %vm206_vm3, %v1020_v7 }
0x16c1   :  { %v1030_v8 = vld [vmem:[#allocation3 + $0x38] sm:$0xff] }
0x16c2   :  { %2443 = vmatmul.mubr.msk.f32.gmra.mrb[16].mxu0 %vm206_vm3, %v1030_v8 }
0x16c3   :  { %2475 = vmatprep.mubr.msk.f32.mxu0 %vm2741_vm1, %v2742_v16 }
0x1709   :  { %v1370_v20 = vpop.permute.xlu1 %1369 }
0x170a   :  { %v1372_v22 = vmul.f32 %v1370_v20, %v1367_v19  ;;  %v1596_v19 = vld [vmem:[#allocation2 + $0x20] sm:$0xff] }
0x170c   :  { %1374 = vrot.lane.b32.xlu1 %v1372_v22, %s2743_s23 }
0x177e   :  { %v1375_v23 = vpop.permute.xlu1 %1374 }
0x177f   :  { %v1377_v9 = vadd.f32 %v1375_v23, %v1290_v11 }
0x1781   :  { %2714 = vtanh.f32 %v1377_v9 }
0x178b   :  { %v2715_v24 = vpop.eup %2714 }
0x178c   :  { %1381 = vrot.lane.b32.xlu1 %v2715_v24, %s2744_s4 }
0x1795   :  { %v2444_v25 = vpop.f32.mrb[16].mxu0 }
0x1796   :  { %v1168_v26 = vadd.f32 %v2444_v25, %v3004_v52  ;;  %v1162_v27 = vpop.f32.mrb[17].mxu0 }
0x1797   :  { %v1163_v15 = vadd.f32 %v3004_v52, %v1162_v27 }
0x1798   :  { %1178 = vst.msk [vmem:[#allocation2 + $0x38] sm:$0xff] %vm185_vm2, %v1168_v26 }
0x1799   :  { %1177 = vst.msk [vmem:[#allocation2 + $0x30] sm:$0xff] %vm185_vm2, %v1163_v15 }
0x17fe   :  { %v1382_v31 = vpop.permute.xlu1 %1381 }
0x17ff   :  { %v1384_v33 = vmul.f32 %v1382_v31, %v1379_v28 }
0x1801   :  { %v1386_v34 = vadd.f32 %v1385_v32, %v1384_v33 }
0x1803   :  { %1388 = vrot.lane.b32.xlu1 %v1386_v34, %s2744_s4 }
0x1875   :  { %v1389_v35 = vpop.permute.xlu1 %1388 }
0x1876   :  { %1391 = vst.msk [vmem:[#allocation3 + $0x8] sm:$0xff] %vm206_vm3, %v1389_v35  ;;  %2476 = vmatmul.mubr.msk.f32.vlgmr.msra.gmra.mrb[18].mxu0 %vm206_vm3, %v1389_v35 }
0x1877   :  { %2639 = vmatpush3.bf16.msra.mxu0 %v3026_v18  ;;  %2497 = vmatprep.mubr.msk.f32.mxu0 %vm2741_vm1, %v2742_v16 }
0x1878   :  { %2640 = vmatprep.subr.bf16.mxu0 %v2740_v10 }
0x187b   :  { %2642 = vmatpush3.bf16.msra.mxu0 %v3036_v21 }
0x187c   :  { %2649 = vmatprep.subr.bf16.mxu0 %v2740_v10 }
0x1949   :  { %v1461_v52 = vpop.f32.mrb[18].mxu0 }
0x194a   :  { %v1462_v36 = vadd.f32 %v3064_v29, %v1461_v52  ;;  %v2477_v37 = vpop.f32.mrb[19].mxu0 }
0x194c   :  { %1471 = vrot.lane.b32.xlu0 %v1462_v36, %s2743_s23  ;;  %v1465_v39 = vadd.f32 %v1462_v36, %v1392_v38 }
0x194e   :  { %v1466_v40 = vmul.f32 0.5, %v1465_v39  ;;  %v1698_v39 = vld [vmem:[#allocation2 + $0x28] sm:$0xff] }
0x1950   :  { %2716 = vtanh.f32 %v1466_v40 }
0x195a   :  { %v2717_v41 = vpop.eup %2716 }
0x195b   :  { %v1468_v42 = vadd.f32 1.0, %v2717_v41 }
0x195d   :  { %v1469_v43 = vmul.f32 0.5, %v1468_v42 }
0x195f   :  { %v1481_v49 = vsub.f32 1.0, %v1469_v43  ;;  %v1487_v51 = vmul.f32 %v1469_v43, %v1386_v34 }
0x19be   :  { %v1472_v44 = vpop.permute.xlu0 %1471 }
0x19bf   :  { %v1474_v45 = vmul.f32 %v1472_v44, %v1469_v43 }
0x19c1   :  { %1476 = vrot.lane.b32.xlu1 %v1474_v45, %s2743_s23 }
0x1a33   :  { %v1477_v46 = vpop.permute.xlu1 %1476 }
0x1a34   :  { %v1479_v47 = vadd.f32 %v1477_v46, %v1392_v38  ;;  %v2013_v46 = vld [vmem:[%s3241_s9 + $0x8] sm:$0xff] }
0x1a36   :  { %2718 = vtanh.f32 %v1479_v47 }
0x1a40   :  { %v2719_v48 = vpop.eup %2718 }
0x1a41   :  { %1483 = vrot.lane.b32.xlu0 %v2719_v48, %s2744_s4 }
0x1ab3   :  { %v1484_v50 = vpop.permute.xlu0 %1483 }
0x1ab4   :  { %v1486_v53 = vmul.f32 %v1484_v50, %v1481_v49 }
0x1ab6   :  { %v1488_v54 = vadd.f32 %v1487_v51, %v1486_v53 }
0x1ab8   :  { %1490 = vrot.lane.b32.xlu1 %v1488_v54, %s2744_s4 }
0x1b2a   :  { %v1491_v55 = vpop.permute.xlu1 %1490 }
0x1b2b   :  { %1493 = vst.msk [vmem:[#allocation3 + $0x10] sm:$0xff] %vm206_vm3, %v1491_v55  ;;  %2487 = vmatmul.mubr.msk.f32.vlgmr.msra.gmra.mrb[18].mxu1 %vm206_vm3, %v1491_v55  ;;  %v2014_v55 = vld [vmem:[%s3241_s9 + $0x10] sm:$0xff] }
0x1b2c   :  { %2645 = vmatpush3.bf16.msra.mxu1 %v3026_v18  ;;  %2508 = vmatprep.mubr.msk.f32.mxu1 %vm2741_vm1, %v2742_v16 }
0x1b2d   :  { %2646 = vmatprep.subr.bf16.mxu1 %v2740_v10 }
0x1b30   :  { %2648 = vmatpush3.bf16.msra.mxu1 %v3036_v21 }
0x1b31   :  { %2655 = vmatprep.subr.bf16.mxu1 %v2740_v10 }
0x1bfe   :  { %v1563_v56 = vpop.f32.mrb[18].mxu1 }
0x1bff   :  { %v1564_v57 = vadd.f32 %v3064_v29, %v1563_v56  ;;  %v2488_v58 = vpop.f32.mrb[19].mxu1  ;;  %v2015_v56 = vld [vmem:[%s3241_s9 + $0x18] sm:$0xff] }
0x1c01   :  { %1573 = vrot.lane.b32.xlu0 %v1564_v57, %s2743_s23  ;;  %v1567_v30 = vadd.f32 %v1564_v57, %v1494_v59  ;;  %v2665_v57 = vpack.c.bf16 %v2015_v56, %v2014_v55 }
0x1c03   :  { %v1568_v60 = vmul.f32 0.5, %v1567_v30  ;;  %v2005_v30 = vld [vmem:[#allocation3 + $0x8] sm:$0xff] }
0x1c05   :  { %2720 = vtanh.f32 %v1568_v60  ;;  %v2006_v60 = vld [vmem:[#allocation3 + $0x10] sm:$0xff] }
0x1c0f   :  { %v2721_v61 = vpop.eup %2720 }
0x1c10   :  { %v1570_v62 = vadd.f32 1.0, %v2721_v61 }
0x1c12   :  { %v1571_v63 = vmul.f32 0.5, %v1570_v62 }
0x1c14   :  { %v1583_v5 = vsub.f32 1.0, %v1571_v63  ;;  %v1589_v7 = vmul.f32 %v1571_v63, %v1488_v54 }
0x1c73   :  { %v1574_v0 = vpop.permute.xlu0 %1573 }
0x1c74   :  { %v1576_v1 = vmul.f32 %v1574_v0, %v1571_v63 }
0x1c76   :  { %1578 = vrot.lane.b32.xlu1 %v1576_v1, %s2743_s23 }
0x1ce8   :  { %v1579_v2 = vpop.permute.xlu1 %1578 }
0x1ce9   :  { %v1581_v3 = vadd.f32 %v1579_v2, %v1494_v59  ;;  %v2004_v59 = vld [vmem:[#allocation3] sm:$0xff] }
0x1ceb   :  { %2722 = vtanh.f32 %v1581_v3  ;;  %v3176_v3 = vld [vmem:[%s3242_s10] ss:$0 sm:$0xff] }
0x1cf5   :  { %v2723_v4 = vpop.eup %2722 }
0x1cf6   :  { %1585 = vrot.lane.b32.xlu0 %v2723_v4, %s2744_s4 }
0x1d68   :  { %v1586_v6 = vpop.permute.xlu0 %1585 }
0x1d69   :  { %v1588_v8 = vmul.f32 %v1586_v6, %v1583_v5 }
0x1d6b   :  { %v1590_v11 = vadd.f32 %v1589_v7, %v1588_v8 }
0x1d6d   :  { %1592 = vrot.lane.b32.xlu1 %v1590_v11, %s2744_s4 }
0x1ddf   :  { %v1593_v12 = vpop.permute.xlu1 %1592 }
0x1de0   :  { %1595 = vst.msk [vmem:[#allocation3 + $0x18] sm:$0xff] %vm206_vm3, %v1593_v12  ;;  %2498 = vmatmul.mubr.msk.f32.vlgmr.msra.gmra.mrb[20].mxu0 %vm206_vm3, %v1593_v12 }
0x1de1   :  { %2651 = vmatpush3.bf16.msra.mxu0 %v3026_v18  ;;  %2519 = vmatprep.mubr.msk.f32.mxu0 %vm2741_vm1, %v2742_v16 }
0x1de2   :  { %2652 = vmatprep.subr.bf16.mxu0 %v2740_v10 }
0x1de5   :  { %2654 = vmatpush3.bf16.msra.mxu0 %v3036_v21 }
0x1de7   :  { %v2007_v61 = vld [vmem:[#allocation3 + $0x18] sm:$0xff] }
0x1eb3   :  { %v1665_v13 = vpop.f32.mrb[20].mxu0 }
0x1eb4   :  { %v1666_v14 = vadd.f32 %v3064_v29, %v1665_v13  ;;  %v2499_v17 = vpop.f32.mrb[21].mxu0 }
0x1eb6   :  { %1675 = vrot.lane.b32.xlu0 %v1666_v14, %s2743_s23  ;;  %v1669_v20 = vadd.f32 %v1666_v14, %v1596_v19 }
0x1eb8   :  { %v1670_v22 = vmul.f32 0.5, %v1669_v20 }
0x1eba   :  { %2724 = vtanh.f32 %v1670_v22  ;;  %v1800_v22 = vld [vmem:[#allocation2 + $0x30] sm:$0xff] }
0x1ec4   :  { %v2725_v23 = vpop.eup %2724 }
0x1ec5   :  { %v1672_v9 = vadd.f32 1.0, %v2725_v23 }
0x1ec7   :  { %v1673_v24 = vmul.f32 0.5, %v1672_v9 }
0x1ec9   :  { %v1685_v31 = vsub.f32 1.0, %v1673_v24  ;;  %v1691_v33 = vmul.f32 %v1673_v24, %v1590_v11 }
0x1f28   :  { %v1676_v25 = vpop.permute.xlu0 %1675 }
0x1f29   :  { %v1678_v26 = vmul.f32 %v1676_v25, %v1673_v24 }
0x1f2b   :  { %1680 = vrot.lane.b32.xlu1 %v1678_v26, %s2743_s23 }
0x1f9d   :  { %v1681_v27 = vpop.permute.xlu1 %1680 }
0x1f9e   :  { %v1683_v15 = vadd.f32 %v1681_v27, %v1596_v19 }
0x1fa0   :  { %2726 = vtanh.f32 %v1683_v15 }
0x1faa   :  { %v2727_v28 = vpop.eup %2726 }
0x1fab   :  { %1687 = vrot.lane.b32.xlu0 %v2727_v28, %s2744_s4 }
0x201d   :  { %v1688_v32 = vpop.permute.xlu0 %1687 }
0x201e   :  { %v1690_v34 = vmul.f32 %v1688_v32, %v1685_v31 }
0x2020   :  { %v1692_v35 = vadd.f32 %v1691_v33, %v1690_v34 }
0x2022   :  { %1694 = vrot.lane.b32.xlu1 %v1692_v35, %s2744_s4 }
0x2094   :  { %v1695_v52 = vpop.permute.xlu1 %1694 }
0x2095   :  { %1697 = vst.msk [vmem:[#allocation3 + $0x20] sm:$0xff] %vm206_vm3, %v1695_v52  ;;  %2509 = vmatmul.mubr.msk.f32.vlgmr.msra.gmra.mrb[20].mxu1 %vm206_vm3, %v1695_v52 }
0x2096   :  { %2657 = vmatpush3.bf16.msra.mxu1 %v3026_v18  ;;  %2530 = vmatprep.mubr.msk.f32.mxu1 %vm2741_vm1, %v2742_v16 }
0x2097   :  { %2658 = vmatprep.subr.bf16.mxu1 %v2740_v10 }
0x209a   :  { %2660 = vmatpush3.bf16.msra.mxu1 %v3036_v21  ;;  %v2012_v21 = vld [vmem:[%s3241_s9] sm:$0xff] }
0x209b   :  { %v2661_v47 = vpack.c.bf16 %v2013_v46, %v2012_v21 }
0x209c   :  { %v2008_v62 = vld [vmem:[#allocation3 + $0x20] sm:$0xff] }
0x209d   :  { %2662 = vmatprep.subr.bf16.mxu0 %v2661_v47 }
0x2168   :  { %v1767_v36 = vpop.f32.mrb[20].mxu1 }
0x2169   :  { %v1768_v37 = vadd.f32 %v3064_v29, %v1767_v36  ;;  %v2510_v38 = vpop.f32.mrb[21].mxu1 }
0x216b   :  { %1777 = vrot.lane.b32.xlu0 %v1768_v37, %s2743_s23  ;;  %v1771_v40 = vadd.f32 %v1768_v37, %v1698_v39 }
0x216d   :  { %v1772_v41 = vmul.f32 0.5, %v1771_v40 }
0x216f   :  { %2728 = vtanh.f32 %v1772_v41 }
0x2179   :  { %v2729_v42 = vpop.eup %2728 }
0x217a   :  { %v1774_v43 = vadd.f32 1.0, %v2729_v42  ;;  %v1902_v42 = vld [vmem:[#allocation2 + $0x38] sm:$0xff] }
0x217c   :  { %v1775_v18 = vmul.f32 0.5, %v1774_v43 }
0x217e   :  { %v1787_v49 = vsub.f32 1.0, %v1775_v18  ;;  %v1793_v51 = vmul.f32 %v1775_v18, %v1692_v35 }
0x21dd   :  { %v1778_v44 = vpop.permute.xlu0 %1777 }
0x21de   :  { %v1780_v45 = vmul.f32 %v1778_v44, %v1775_v18 }
0x21e0   :  { %1782 = vrot.lane.b32.xlu1 %v1780_v45, %s2743_s23 }
0x2252   :  { %v1783_v10 = vpop.permute.xlu1 %1782 }
0x2253   :  { %v1785_v16 = vadd.f32 %v1783_v10, %v1698_v39 }
0x2255   :  { %2730 = vtanh.f32 %v1785_v16 }
0x225f   :  { %v2731_v48 = vpop.eup %2730 }
0x2260   :  { %1789 = vrot.lane.b32.xlu0 %v2731_v48, %s2744_s4 }
0x22d2   :  { %v1790_v50 = vpop.permute.xlu0 %1789 }
0x22d3   :  { %v1792_v53 = vmul.f32 %v1790_v50, %v1787_v49 }
0x22d5   :  { %v3153_v54 = vadd.f32 %v1793_v51, %v1792_v53 }
0x22d7   :  { %1796 = vrot.lane.b32.xlu1 %v3153_v54, %s2744_s4 }
0x2349   :  { %v1797_v58 = vpop.permute.xlu1 %1796 }
0x234a   :  { %1799 = vst.msk [vmem:[#allocation3 + $0x28] sm:$0xff] %vm206_vm3, %v1797_v58  ;;  %2520 = vmatmul.mubr.msk.f32.vlgmr.msra.gmra.mrb[22].mxu0 %vm206_vm3, %v1797_v58 }
0x234b   :  { %2664 = vmatpush3.bf16.msra.mxu0 %v2661_v47  ;;  %2541 = vmatprep.mubr.msk.f32.mxu0 %vm206_vm3, %v2004_v59 }
0x234c   :  { %2666 = vmatprep.subr.bf16.mxu0 %v2665_v57 }
0x234f   :  { %2668 = vmatpush3.bf16.msra.mxu0 %v2665_v57 }
0x2351   :  { %v2009_v63 = vld [vmem:[#allocation3 + $0x28] sm:$0xff] }
0x2352   :  { %2542 = vmatmul.mubr.msk.f32.vlgmr.msra.gmra.mrb[24].mxu0 %vm206_vm3, %v2005_v30 }
0x2353   :  { %2544 = vmatprep.mubr.msk.f32.mxu0 %vm206_vm3, %v2006_v60 }
0x2356   :  { %2545 = vmatmul.mubr.msk.f32.gmra.mrb[26].mxu0 %vm206_vm3, %v2007_v61 }
0x2357   :  { %2547 = vmatprep.mubr.msk.f32.mxu0 %vm206_vm3, %v2008_v62 }
0x235a   :  { %2548 = vmatmul.mubr.msk.f32.gmra.mrb[28].mxu0 %vm206_vm3, %v2009_v63 }
0x241d   :  { %v1869_v0 = vpop.f32.mrb[22].mxu0 }
0x241e   :  { %v1870_v1 = vadd.f32 %v3064_v29, %v1869_v0  ;;  %v2521_v2 = vpop.f32.mrb[23].mxu0 }
0x2420   :  { %1879 = vrot.lane.b32.xlu0 %v1870_v1, %s2743_s23  ;;  %v1873_v23 = vadd.f32 %v1870_v1, %v1800_v22 }
0x2422   :  { %v1874_v9 = vmul.f32 0.5, %v1873_v23 }
0x2424   :  { %2732 = vtanh.f32 %v1874_v9 }
0x2425   :  { %v2543_v4 = vpop.f32.mrb[24].mxu0 }
0x2426   :  { %v2119_v5 = vadd.f32 %v2543_v4, %v3176_v3  ;;  %v2113_v6 = vpop.f32.mrb[25].mxu0 }
0x2427   :  { %v2114_v7 = vadd.f32 %v3176_v3, %v2113_v6 }
0x2428   :  { %2153 = vst.msk [vmem:[%s3243_s11 + $0x8] sm:$0xff] %vm55_vm0, %v2119_v5 }
0x2429   :  { %2152 = vst.msk [vmem:[%s3243_s11] sm:$0xff] %vm55_vm0, %v2114_v7  ;;  %v2546_v8 = vpop.f32.mrb[26].mxu0 }
0x242a   :  { %v2129_v11 = vadd.f32 %v2546_v8, %v3176_v3  ;;  %v2123_v12 = vpop.f32.mrb[27].mxu0 }
0x242b   :  { %v2124_v13 = vadd.f32 %v3176_v3, %v2123_v12 }
0x242c   :  { %2155 = vst.msk [vmem:[%s3243_s11 + $0x18] sm:$0xff] %vm55_vm0, %v2129_v11 }
0x242d   :  { %2154 = vst.msk [vmem:[%s3243_s11 + $0x10] sm:$0xff] %vm55_vm0, %v2124_v13  ;;  %v2549_v14 = vpop.f32.mrb[28].mxu0 }
0x242e   :  { %v2139_v17 = vadd.f32 %v2549_v14, %v3176_v3  ;;  %v2133_v19 = vpop.f32.mrb[29].mxu0  ;;  %v2733_v24 = vpop.eup %2732 }
0x242f   :  { %v2134_v20 = vadd.f32 %v3176_v3, %v2133_v19  ;;  %v1876_v25 = vadd.f32 1.0, %v2733_v24 }
0x2430   :  { %2157 = vst.msk [vmem:[%s3243_s11 + $0x28] sm:$0xff] %vm55_vm0, %v2139_v17 }
0x2431   :  { %2156 = vst.msk [vmem:[%s3243_s11 + $0x20] sm:$0xff] %vm55_vm0, %v2134_v20  ;;  %v1877_v26 = vmul.f32 0.5, %v1876_v25 }
0x2433   :  { %v1889_v33 = vsub.f32 1.0, %v1877_v26  ;;  %v1895_v35 = vmul.f32 %v1877_v26, %v3153_v54 }
0x2492   :  { %v1880_v27 = vpop.permute.xlu0 %1879 }
0x2493   :  { %v1882_v15 = vmul.f32 %v1880_v27, %v1877_v26 }
0x2495   :  { %1884 = vrot.lane.b32.xlu1 %v1882_v15, %s2743_s23 }
0x2507   :  { %v1885_v28 = vpop.permute.xlu1 %1884 }
0x2508   :  { %v1887_v31 = vadd.f32 %v1885_v28, %v1800_v22 }
0x250a   :  { %2734 = vtanh.f32 %v1887_v31 }
0x2514   :  { %v2735_v32 = vpop.eup %2734 }
0x2515   :  { %1891 = vrot.lane.b32.xlu0 %v2735_v32, %s2744_s4 }
0x2587   :  { %v1892_v34 = vpop.permute.xlu0 %1891 }
0x2588   :  { %v1894_v52 = vmul.f32 %v1892_v34, %v1889_v33 }
0x258a   :  { %v1896_v36 = vadd.f32 %v1895_v35, %v1894_v52 }
0x258c   :  { %1898 = vrot.lane.b32.xlu1 %v1896_v36, %s2744_s4 }
0x25fe   :  { %v1899_v37 = vpop.permute.xlu1 %1898 }
0x25ff   :  { %1901 = vst.msk [vmem:[#allocation3 + $0x30] sm:$0xff] %vm206_vm3, %v1899_v37  ;;  %2531 = vmatmul.mubr.msk.f32.vlgmr.msra.gmra.mrb[22].mxu1 %vm206_vm3, %v1899_v37 }
0x2606   :  { %v2010_v38 = vld [vmem:[#allocation3 + $0x30] sm:$0xff] }
0x2607   :  { %2550 = vmatprep.mubr.msk.f32.mxu0 %vm206_vm3, %v2010_v38 }
0x26d2   :  { %v1971_v39 = vpop.f32.mrb[22].mxu1 }
0x26d3   :  { %v1972_v40 = vadd.f32 %v3064_v29, %v1971_v39  ;;  %v2532_v41 = vpop.f32.mrb[23].mxu1 }
0x26d5   :  { %1981 = vrot.lane.b32.xlu0 %v1972_v40, %s2743_s23  ;;  %v1975_v43 = vadd.f32 %v1972_v40, %v1902_v42 }
0x26d7   :  { %v1976_v18 = vmul.f32 0.5, %v1975_v43 }
0x26d9   :  { %2736 = vtanh.f32 %v1976_v18 }
0x26e3   :  { %v2737_v44 = vpop.eup %2736 }
0x26e4   :  { %v1978_v45 = vadd.f32 1.0, %v2737_v44 }
0x26e6   :  { %v1979_v10 = vmul.f32 0.5, %v1978_v45 }
0x26e8   :  { %v1991_v29 = vsub.f32 1.0, %v1979_v10  ;;  %v1997_v50 = vmul.f32 %v1979_v10, %v1896_v36 }
0x2747   :  { %v1982_v16 = vpop.permute.xlu0 %1981 }
0x2748   :  { %v1984_v21 = vmul.f32 %v1982_v16, %v1979_v10 }
0x274a   :  { %1986 = vrot.lane.b32.xlu1 %v1984_v21, %s2743_s23 }
0x27bc   :  { %v1987_v46 = vpop.permute.xlu1 %1986 }
0x27bd   :  { %v1989_v47 = vadd.f32 %v1987_v46, %v1902_v42 }
0x27bf   :  { %2738 = vtanh.f32 %v1989_v47 }
0x27c9   :  { %v2739_v48 = vpop.eup %2738 }
0x27ca   :  { %1993 = vrot.lane.b32.xlu0 %v2739_v48, %s2744_s4 }
0x283c   :  { %v1994_v49 = vpop.permute.xlu0 %1993 }
0x283d   :  { %v1996_v51 = vmul.f32 %v1994_v49, %v1991_v29 }
0x283f   :  { %v1998_v53 = vadd.f32 %v1997_v50, %v1996_v51 }
0x2841   :  { %2000 = vrot.lane.b32.xlu1 %v1998_v53, %s2744_s4 }
0x28b3   :  { %v2001_v54 = vpop.permute.xlu1 %2000 }
0x28b4   :  { %2003 = vst.msk [vmem:[#allocation3 + $0x38] sm:$0xff] %vm206_vm3, %v2001_v54 }
0x28bb   :  { %v2011_v55 = vld [vmem:[#allocation3 + $0x38] sm:$0xff] }
0x28bc   :  { %2551 = vmatmul.mubr.msk.f32.gmra.mrb[30].mxu0 %vm206_vm3, %v2011_v55 }
0x298f   :  { %v2552_v56 = vpop.f32.mrb[30].mxu0 }
0x2990   :  { %v2149_v57 = vadd.f32 %v2552_v56, %v3176_v3  ;;  %v2143_v58 = vpop.f32.mrb[31].mxu0 }
0x2991   :  { %v2144_v59 = vadd.f32 %v3176_v3, %v2143_v58 }
0x2992   :  { %2159 = vst.msk [vmem:[%s3243_s11 + $0x38] sm:$0xff] %vm55_vm0, %v2149_v57 }
0x2993   :  { %2158 = vst.msk [vmem:[%s3243_s11 + $0x30] sm:$0xff] %vm55_vm0, %v2144_v59 }

</bundles_post_ra>
